<compile_context>
chip_gen: v5e
topology: v5e:2x2
jax: 0.10.0
libtpu: 0.0.40
codegen_flags: <defaults>
</compile_context>

<pallas_src>
import functools

import jax
import jax.numpy as jnp
from jax import lax
from jax.experimental import pallas as pl
from jax.experimental.pallas import tpu as pltpu


def _ln(x, g, b, eps):
    mu = jnp.mean(x, axis=-1, keepdims=True)
    xc = x - mu
    var = jnp.mean(xc * xc, axis=-1, keepdims=True)
    return xc * lax.rsqrt(var + eps) * g + b


# ----------------------------- kernel ----------------------------------------

def stack_kernel(we_ref, pe_ref, m_ref, eg_ref, eb_ref,
                 wqkv_ref, bqkv_ref, wo_ref, bo_ref,
                 g1_ref, be1_ref, w1_ref, b1_ref, w2_ref, b2_ref,
                 g2_ref, be2_ref,
                 o_ref,
                 ctx_sc,
                 *, num_heads, head_dim, bb, seq, inter, ff_chunk):
    l = pl.program_id(1)
    H = num_heads * head_dim
    rows = bb * seq
    EPS = 1e-12

    @pl.when(l == 0)
    def _():
        # Fused embedding add + LayerNorm feeds the resident hidden state.
        emb = we_ref[...] + pe_ref[...]
        o_ref[...] = _ln(emb, eg_ref[...], eb_ref[...], EPS)

    x = o_ref[...].reshape(rows, H)                      # resident hidden (f32)

    # Fused QKV projection (1/sqrt(dh) already folded into q weights/bias);
    # cast to bf16 right away so the (rows, 3H) f32 product dies early.
    qkv = (jnp.dot(x.astype(jnp.bfloat16), wqkv_ref[0],
                   preferred_element_type=jnp.float32) + bqkv_ref[0]
           ).astype(jnp.bfloat16)                        # (rows, 3H)

    # Attention: two heads per step -> 2*head_dim-wide slices (128 lanes at
    # real DistilBERT sizes) and one lane-aligned bf16 context store per pair.
    for b in range(bb):
        r = slice(b * seq, (b + 1) * seq)
        madd = m_ref[b]                                  # (1, S) additive mask
        for h0 in range(0, num_heads, 2):
            nh = min(2, num_heads - h0)
            parts = []
            for j in range(nh):
                c = (h0 + j) * head_dim
                qh = qkv[r, c:c + head_dim]
                kh = qkv[r, H + c:H + c + head_dim]
                vh = qkv[r, 2 * H + c:2 * H + c + head_dim]
                s = lax.dot_general(qh, kh, (((1,), (1,)), ((), ())),
                                    preferred_element_type=jnp.float32)
                s = s + madd
                p = jnp.exp(s - jnp.max(s, axis=-1, keepdims=True))
                p = p * pl.reciprocal(jnp.sum(p, axis=-1, keepdims=True),
                                      approx=True)
                parts.append(jnp.dot(p.astype(jnp.bfloat16), vh,
                                     preferred_element_type=jnp.float32))
            ctx_sc[b, :, h0 * head_dim:(h0 + nh) * head_dim] = (
                jnp.concatenate(parts, axis=-1).astype(jnp.bfloat16))

    # Output projection + residual + LayerNorm.
    attn = jnp.dot(ctx_sc[...].reshape(rows, H), wo_ref[0],
                   preferred_element_type=jnp.float32) + bo_ref[0]
    h1 = _ln(x + attn, g1_ref[0], be1_ref[0], EPS)

    # FFN blocked over the intermediate dim: only an (rows, ff_chunk) f32 slab
    # of the GELU intermediate is live at a time.
    # TODO(synk): HF DistilBERT uses exact erf GELU; tanh approximation here
    # (matches the in-file reference).
    h1b = h1.astype(jnp.bfloat16)
    ff = jnp.zeros((rows, H), jnp.float32)
    for c0 in range(0, inter, ff_chunk):
        cs = slice(c0, c0 + ff_chunk)
        part = jnp.dot(h1b, w1_ref[0, :, cs],
                       preferred_element_type=jnp.float32) + b1_ref[0, :, cs]
        part = jax.nn.gelu(part).astype(jnp.bfloat16)
        ff = ff + jnp.dot(part, w2_ref[0, cs, :],
                          preferred_element_type=jnp.float32)
    ff = ff + b2_ref[0]

    o_ref[...] = _ln(h1 + ff, g2_ref[0], be2_ref[0], EPS).reshape(bb, seq, H)


# ----------------------------- wrappers --------------------------------------

def _vmem_limit_bytes():
    # ~75% of physical VMEM (headroom for compiler-internal scratch), capped at
    # 100 MiB.  v7x (64 MiB physical) -> 48 MiB; v5e/v6e (128 MiB) -> 96 MiB.
    try:
        cap = int(pltpu.get_tpu_info().vmem_capacity_bytes)
    except Exception:
        cap = 64 * 1024 * 1024
    return int(min(cap * 3 // 4, 100 * 1024 * 1024))


def _pick_batch_block(batch, max_bb=4):
    bb = 1
    for c in range(1, min(batch, max_bb) + 1):
        if batch % c == 0:
            bb = c
    return bb


def transformer_stack(word_emb, pos_emb, mask_add, params, num_heads,
                      batch_block=None):
    B, S, H = word_emb.shape
    L = params["wqkv"].shape[0]
    I = params["w1"].shape[2]
    head_dim = H // num_heads

    bb = _pick_batch_block(B) if batch_block is None else batch_block
    assert B % bb == 0, "batch must be divisible by the batch block"
    nb = B // bb
    ff_chunk = 1024 if I % 1024 == 0 else I

    def wspec(shape):
        # Layer-stacked weight block, indexed by the layer grid coordinate only.
        return pl.BlockSpec((1,) + shape, lambda b, l: (l, 0, 0))

    kern = functools.partial(stack_kernel, num_heads=num_heads,
                             head_dim=head_dim, bb=bb, seq=S, inter=I,
                             ff_chunk=ff_chunk)

    weight_keys = ("wqkv", "bqkv", "wo", "bo", "ln1_g", "ln1_b",
                   "w1", "b1", "w2", "b2", "ln2_g", "ln2_b")
    weight_bytes = sum(int(params[k].size) * jnp.dtype(params[k].dtype).itemsize
                       for k in weight_keys)
    hidden_bytes = B * S * H * 4
    cost = pl.CostEstimate(
        flops=int(2 * B * L * (3 * S * H * H + 2 * S * S * H
                               + S * H * H + 2 * S * H * I)),
        transcendentals=int(B * L * (num_heads * S * S + S * I)),
        bytes_accessed=int(nb * weight_bytes + 3 * hidden_bytes),
    )

    return pl.pallas_call(
        kern,
        out_shape=jax.ShapeDtypeStruct((B, S, H), jnp.float32),
        grid=(nb, L),
        in_specs=[
            pl.BlockSpec((bb, S, H), lambda b, l: (b, 0, 0)),   # word embeddings
            pl.BlockSpec((S, H), lambda b, l: (0, 0)),          # position embs
            pl.BlockSpec((bb, 1, S), lambda b, l: (b, 0, 0)),   # additive mask
            pl.BlockSpec((1, H), lambda b, l: (0, 0)),          # emb LN gamma
            pl.BlockSpec((1, H), lambda b, l: (0, 0)),          # emb LN beta
            wspec((H, 3 * H)), wspec((1, 3 * H)),               # wqkv, bqkv
            wspec((H, H)), wspec((1, H)),                       # wo, bo
            wspec((1, H)), wspec((1, H)),                       # ln1 gamma/beta
            wspec((H, I)), wspec((1, I)),                       # w1, b1
            wspec((I, H)), wspec((1, H)),                       # w2, b2
            wspec((1, H)), wspec((1, H)),                       # ln2 gamma/beta
        ],
        out_specs=pl.BlockSpec((bb, S, H), lambda b, l: (b, 0, 0)),  # resident over L
        scratch_shapes=[pltpu.VMEM((bb, S, H), jnp.bfloat16)],       # ctx (bf16)
        compiler_params=pltpu.CompilerParams(
            dimension_semantics=("parallel", "arbitrary"),
            vmem_limit_bytes=_vmem_limit_bytes(),
        ),
        cost_estimate=cost,
    )(word_emb, pos_emb, mask_add,
      params["emb_ln_g"], params["emb_ln_b"],
      params["wqkv"], params["bqkv"], params["wo"], params["bo"],
      params["ln1_g"], params["ln1_b"], params["w1"], params["b1"],
      params["w2"], params["b2"], params["ln2_g"], params["ln2_b"])


def prepare_params(params, num_heads):
    """One-time weight transform: fold 1/sqrt(head_dim) into the q columns."""
    H = params["word_embeddings"].shape[1]
    scale = 1.0 / float(H // num_heads) ** 0.5
    p = dict(params)
    wqkv = params["wqkv"].astype(jnp.float32)
    p["wqkv"] = wqkv.at[:, :, :H].multiply(scale).astype(params["wqkv"].dtype)
    p["bqkv"] = params["bqkv"].at[:, :, :H].multiply(scale)
    return p


def distilbert_forward(params, input_ids, attention_mask, num_heads,
                       batch_block=None):
    B, S = input_ids.shape
    # Embedding gathers are glue (plain JAX); everything else runs in the kernel.
    word_emb = jnp.take(params["word_embeddings"], input_ids, axis=0)   # (B,S,H)
    pos_emb = params["position_embeddings"][:S]                          # (S,H)
    # Dropout: identity (eval mode).
    mask_add = ((1.0 - attention_mask.astype(jnp.float32)) * -1e9)[:, None, :]
    return transformer_stack(word_emb, pos_emb, mask_add, params, num_heads,
                             batch_block)


# ----------------------------- reference (pure JAX) ---------------------------

def _ref_forward(params, input_ids, attention_mask, num_heads):
    B, S = input_ids.shape
    H = params["word_embeddings"].shape[1]
    dh = H // num_heads
    L = params["wqkv"].shape[0]
    x = jnp.take(params["word_embeddings"], input_ids, axis=0) + \
        params["position_embeddings"][:S][None, :, :]
    x = _ln(x, params["emb_ln_g"][0], params["emb_ln_b"][0], 1e-12)
    mask_add = ((1.0 - attention_mask.astype(jnp.float32)) * -1e9)[:, None, None, :]
    for l in range(L):
        wqkv = params["wqkv"][l].astype(jnp.float32)
        qkv = x @ wqkv + params["bqkv"][l][0]
        q, k, v = qkv[..., :H], qkv[..., H:2 * H], qkv[..., 2 * H:]
        q = q.reshape(B, S, num_heads, dh).transpose(0, 2, 1, 3)
        k = k.reshape(B, S, num_heads, dh).transpose(0, 2, 1, 3)
        v = v.reshape(B, S, num_heads, dh).transpose(0, 2, 1, 3)
        s = jnp.einsum("bhqd,bhkd->bhqk", q, k) / dh ** 0.5 + mask_add
        a = jax.nn.softmax(s, axis=-1)
        ctx = jnp.einsum("bhqk,bhkd->bhqd", a, v).transpose(0, 2, 1, 3).reshape(B, S, H)
        wo = params["wo"][l].astype(jnp.float32)
        h1 = _ln(x + ctx @ wo + params["bo"][l][0],
                 params["ln1_g"][l][0], params["ln1_b"][l][0], 1e-12)
        w1 = params["w1"][l].astype(jnp.float32)
        w2 = params["w2"][l].astype(jnp.float32)
        ff = jax.nn.gelu(h1 @ w1 + params["b1"][l][0]) @ w2 + params["b2"][l][0]
        x = _ln(h1 + ff, params["ln2_g"][l][0], params["ln2_b"][l][0], 1e-12)
    return x


# ----------------------------- params ------------------------------------------

def _init_params(key, vocab, hidden, layers, inter, max_pos):
    ks = iter(jax.random.split(key, 16))

    def n(shape, dtype=jnp.float32):
        return (0.02 * jax.random.normal(next(ks), shape)).astype(dtype)

    return {
        "word_embeddings": n((vocab, hidden)),
        "position_embeddings": n((max_pos, hidden)),
        "emb_ln_g": jnp.ones((1, hidden), jnp.float32),
        "emb_ln_b": jnp.zeros((1, hidden), jnp.float32),
        # layer weights stacked along a leading L axis; matrices in bf16
        "wqkv": n((layers, hidden, 3 * hidden), jnp.bfloat16),
        "bqkv": n((layers, 1, 3 * hidden)),
        "wo": n((layers, hidden, hidden), jnp.bfloat16),
        "bo": n((layers, 1, hidden)),
        "ln1_g": jnp.ones((layers, 1, hidden), jnp.float32),
        "ln1_b": jnp.zeros((layers, 1, hidden), jnp.float32),
        "w1": n((layers, hidden, inter), jnp.bfloat16),
        "b1": n((layers, 1, inter)),
        "w2": n((layers, inter, hidden), jnp.bfloat16),
        "b2": n((layers, 1, hidden)),
        "ln2_g": jnp.ones((layers, 1, hidden), jnp.float32),
        "ln2_b": jnp.zeros((layers, 1, hidden), jnp.float32),
    }


# ----------------------------- main -------------------------------------------

if __name__ == "__main__":
    # Small, self-consistent shapes.
    VOCAB, HIDDEN, LAYERS, HEADS, INTER, MAX_POS = 100, 32, 2, 4, 64, 16
    B, S = 2, 8

    key = jax.random.PRNGKey(0)
    kp, kid = jax.random.split(key)
    params = _init_params(kp, VOCAB, HIDDEN, LAYERS, INTER, MAX_POS)
    kparams = prepare_params(params, HEADS)     # one-time q-scale fold

    input_ids = jax.random.randint(kid, (B, S), 0, VOCAB, dtype=jnp.int32)
    attention_mask = jnp.array([[1, 1, 1, 1, 1, 1, 1, 1],
                                [1, 1, 1, 1, 1, 1, 0, 0]], dtype=jnp.float32)

    out = distilbert_forward(kparams, input_ids, attention_mask, HEADS)
    out = jax.block_until_ready(out)

    ref = _ref_forward(params, input_ids, attention_mask, HEADS)
    assert out.shape == (B, S, HIDDEN)
    max_err = float(jnp.max(jnp.abs(out - ref)))
    # bf16 matmul inputs + approx reciprocal vs f32 reference -> modest tolerance.
    assert jnp.allclose(out, ref, rtol=3e-2, atol=3e-2), \
        f"mismatch vs JAX reference (max abs err {max_err})"

    print("KERNEL_OK")
</pallas_src>

<mosaic_0001>
module attributes {stable_mosaic.version = 11 : i64} {
  func.func @stack_kernel(%arg0: i32, %arg1: i32, %arg2: memref<2x8x32xf32, #tpu.memory_space<vmem>>, %arg3: memref<8x32xf32, #tpu.memory_space<vmem>>, %arg4: memref<2x1x8xf32, #tpu.memory_space<vmem>>, %arg5: memref<1x32xf32, #tpu.memory_space<vmem>>, %arg6: memref<1x32xf32, #tpu.memory_space<vmem>>, %arg7: memref<1x32x96xbf16, #tpu.memory_space<vmem>>, %arg8: memref<1x1x96xf32, #tpu.memory_space<vmem>>, %arg9: memref<1x32x32xbf16, #tpu.memory_space<vmem>>, %arg10: memref<1x1x32xf32, #tpu.memory_space<vmem>>, %arg11: memref<1x1x32xf32, #tpu.memory_space<vmem>>, %arg12: memref<1x1x32xf32, #tpu.memory_space<vmem>>, %arg13: memref<1x32x64xbf16, #tpu.memory_space<vmem>>, %arg14: memref<1x1x64xf32, #tpu.memory_space<vmem>>, %arg15: memref<1x64x32xbf16, #tpu.memory_space<vmem>>, %arg16: memref<1x1x32xf32, #tpu.memory_space<vmem>>, %arg17: memref<1x1x32xf32, #tpu.memory_space<vmem>>, %arg18: memref<1x1x32xf32, #tpu.memory_space<vmem>>, %arg19: memref<2x8x32xf32, #tpu.memory_space<vmem>>, %arg20: memref<2x8x32xbf16, #tpu.memory_space<vmem>>) attributes {dimension_semantics = [#tpu.dimension_semantics<parallel>, #tpu.dimension_semantics<arbitrary>], iteration_bounds = array<i64: 1, 2>, scalar_prefetch = 0 : i64, scratch_operands = 1 : i64, tpu.core_type = #tpu.core_type<tc>, window_params = [{transform_indices = @transform_0, window_bounds = array<i64: 2, 8, 32>}, {pipeline_mode = #tpu.pipeline_mode<synchronous>, transform_indices = @transform_1, window_bounds = array<i64: 8, 32>}, {transform_indices = @transform_2, window_bounds = array<i64: 2, 1, 8>}, {pipeline_mode = #tpu.pipeline_mode<synchronous>, transform_indices = @transform_3, window_bounds = array<i64: 1, 32>}, {pipeline_mode = #tpu.pipeline_mode<synchronous>, transform_indices = @transform_4, window_bounds = array<i64: 1, 32>}, {transform_indices = @transform_5, window_bounds = array<i64: 1, 32, 96>}, {transform_indices = @transform_6, window_bounds = array<i64: 1, 1, 96>}, {transform_indices = @transform_7, window_bounds = array<i64: 1, 32, 32>}, {transform_indices = @transform_8, window_bounds = array<i64: 1, 1, 32>}, {transform_indices = @transform_9, window_bounds = array<i64: 1, 1, 32>}, {transform_indices = @transform_10, window_bounds = array<i64: 1, 1, 32>}, {transform_indices = @transform_11, window_bounds = array<i64: 1, 32, 64>}, {transform_indices = @transform_12, window_bounds = array<i64: 1, 1, 64>}, {transform_indices = @transform_13, window_bounds = array<i64: 1, 64, 32>}, {transform_indices = @transform_14, window_bounds = array<i64: 1, 1, 32>}, {transform_indices = @transform_15, window_bounds = array<i64: 1, 1, 32>}, {transform_indices = @transform_16, window_bounds = array<i64: 1, 1, 32>}, {transform_indices = @transform_17, window_bounds = array<i64: 2, 8, 32>}]} {
    %c0_i32 = arith.constant 0 : i32
    %0 = arith.cmpi eq, %arg1, %c0_i32 : i32
    %1 = arith.extui %0 : i1 to i32
    %c0_i32_0 = arith.constant 0 : i32
    %2 = arith.cmpi ne, %1, %c0_i32_0 : i32
    scf.if %2 {
      %c0_111 = arith.constant 0 : index
      %c0_112 = arith.constant 0 : index
      %c0_113 = arith.constant 0 : index
      %274 = vector.load %arg2[%c0_111, %c0_112, %c0_113] : memref<2x8x32xf32, #tpu.memory_space<vmem>>, vector<2x8x32xf32>
      %c0_114 = arith.constant 0 : index
      %c0_115 = arith.constant 0 : index
      %275 = vector.load %arg3[%c0_114, %c0_115] : memref<8x32xf32, #tpu.memory_space<vmem>>, vector<8x32xf32>
      %276 = vector.shape_cast %275 : vector<8x32xf32> to vector<1x8x32xf32>
      %277 = vector.broadcast %276 : vector<1x8x32xf32> to vector<2x8x32xf32>
      %278 = arith.addf %274, %277 : vector<2x8x32xf32>
      %c0_116 = arith.constant 0 : index
      %c0_117 = arith.constant 0 : index
      %279 = vector.load %arg5[%c0_116, %c0_117] : memref<1x32xf32, #tpu.memory_space<vmem>>, vector<1x32xf32>
      %c0_118 = arith.constant 0 : index
      %c0_119 = arith.constant 0 : index
      %280 = vector.load %arg6[%c0_118, %c0_119] : memref<1x32xf32, #tpu.memory_space<vmem>>, vector<1x32xf32>
      %cst_120 = arith.constant dense<0.000000e+00> : vector<2x8xf32>
      %281 = vector.multi_reduction <add>, %278, %cst_120 [2] : vector<2x8x32xf32> to vector<2x8xf32>
      %282 = vector.shape_cast %281 : vector<2x8xf32> to vector<2x8x1xf32>
      %cst_121 = arith.constant 3.200000e+01 : f32
      %283 = vector.broadcast %cst_121 : f32 to vector<2x8x1xf32>
      %284 = arith.divf %282, %283 : vector<2x8x1xf32>
      %285 = vector.broadcast %284 : vector<2x8x1xf32> to vector<2x8x32xf32>
      %286 = arith.subf %278, %285 : vector<2x8x32xf32>
      %287 = arith.mulf %286, %286 : vector<2x8x32xf32>
      %cst_122 = arith.constant dense<0.000000e+00> : vector<2x8xf32>
      %288 = vector.multi_reduction <add>, %287, %cst_122 [2] : vector<2x8x32xf32> to vector<2x8xf32>
      %289 = vector.shape_cast %288 : vector<2x8xf32> to vector<2x8x1xf32>
      %cst_123 = arith.constant 3.200000e+01 : f32
      %290 = vector.broadcast %cst_123 : f32 to vector<2x8x1xf32>
      %291 = arith.divf %289, %290 : vector<2x8x1xf32>
      %cst_124 = arith.constant 9.99999996E-13 : f32
      %292 = vector.broadcast %cst_124 : f32 to vector<2x8x1xf32>
      %293 = arith.addf %291, %292 : vector<2x8x1xf32>
      %294 = math.rsqrt %293 : vector<2x8x1xf32>
      %295 = vector.broadcast %294 : vector<2x8x1xf32> to vector<2x8x32xf32>
      %296 = arith.mulf %286, %295 : vector<2x8x32xf32>
      %297 = vector.shape_cast %279 : vector<1x32xf32> to vector<1x1x32xf32>
      %298 = vector.broadcast %297 : vector<1x1x32xf32> to vector<2x8x32xf32>
      %299 = arith.mulf %296, %298 : vector<2x8x32xf32>
      %300 = vector.shape_cast %280 : vector<1x32xf32> to vector<1x1x32xf32>
      %301 = vector.broadcast %300 : vector<1x1x32xf32> to vector<2x8x32xf32>
      %302 = arith.addf %299, %301 : vector<2x8x32xf32>
      %c0_125 = arith.constant 0 : index
      %c0_126 = arith.constant 0 : index
      %c0_127 = arith.constant 0 : index
      %303 = vector.load %arg19[%c0_125, %c0_126, %c0_127] : memref<2x8x32xf32, #tpu.memory_space<vmem>>, vector<2x8x32xf32>
      tpu.vector_store %arg19[%c0_125, %c0_126, %c0_127], %302 {strides = array<i32>} : memref<2x8x32xf32, #tpu.memory_space<vmem>>, vector<2x8x32xf32>,
    } else {
    }
    %c0 = arith.constant 0 : index
    %c0_1 = arith.constant 0 : index
    %c0_2 = arith.constant 0 : index
    %3 = vector.load %arg19[%c0, %c0_1, %c0_2] : memref<2x8x32xf32, #tpu.memory_space<vmem>>, vector<2x8x32xf32>
    %4 = vector.shape_cast %3 : vector<2x8x32xf32> to vector<16x32xf32>
    %5 = arith.truncf %4 : vector<16x32xf32> to vector<16x32xbf16>
    %c0_3 = arith.constant 0 : index
    %c0_4 = arith.constant 0 : index
    %c0_5 = arith.constant 0 : index
    %6 = vector.load %arg7[%c0_3, %c0_4, %c0_5] : memref<1x32x96xbf16, #tpu.memory_space<vmem>>, vector<1x32x96xbf16>
    %7 = vector.shape_cast %6 : vector<1x32x96xbf16> to vector<32x96xbf16>
    %cst = arith.constant dense<0.000000e+00> : vector<16x96xf32>
    %8 = tpu.matmul %5, %7, %cst {dimension_numbers = #tpu.dot_dimension_numbers<[1], [0], [0], [1], [0, 0, 1, 1], [], []>} : vector<16x32xbf16>, vector<32x96xbf16>, vector<16x96xf32> -> vector<16x96xf32>
    %c0_6 = arith.constant 0 : index
    %c0_7 = arith.constant 0 : index
    %c0_8 = arith.constant 0 : index
    %9 = vector.load %arg8[%c0_6, %c0_7, %c0_8] : memref<1x1x96xf32, #tpu.memory_space<vmem>>, vector<1x1x96xf32>
    %10 = vector.shape_cast %9 : vector<1x1x96xf32> to vector<1x96xf32>
    %11 = vector.broadcast %10 : vector<1x96xf32> to vector<16x96xf32>
    %12 = arith.addf %8, %11 : vector<16x96xf32>
    %13 = arith.truncf %12 : vector<16x96xf32> to vector<16x96xbf16>
    %c0_9 = arith.constant 0 : index
    %c0_10 = arith.constant 0 : index
    %c0_11 = arith.constant 0 : index
    %14 = vector.load %arg4[%c0_9, %c0_10, %c0_11] : memref<2x1x8xf32, #tpu.memory_space<vmem>>, vector<1x1x8xf32>
    %15 = vector.shape_cast %14 : vector<1x1x8xf32> to vector<1x8xf32>
    %16 = vector.extract_strided_slice %13 {offsets = [0, 0], sizes = [8, 8], strides = [1, 1]} : vector<16x96xbf16> to vector<8x8xbf16>
    %17 = vector.extract_strided_slice %13 {offsets = [0, 32], sizes = [8, 8], strides = [1, 1]} : vector<16x96xbf16> to vector<8x8xbf16>
    %18 = vector.extract_strided_slice %13 {offsets = [0, 64], sizes = [8, 8], strides = [1, 1]} : vector<16x96xbf16> to vector<8x8xbf16>
    %cst_12 = arith.constant dense<0.000000e+00> : vector<8x8xf32>
    %19 = tpu.matmul %16, %17, %cst_12 {dimension_numbers = #tpu.dot_dimension_numbers<[1], [1], [0], [0], [0, 0, 1, 0], [], []>} : vector<8x8xbf16>, vector<8x8xbf16>, vector<8x8xf32> -> vector<8x8xf32>
    %20 = vector.broadcast %15 : vector<1x8xf32> to vector<8x8xf32>
    %21 = arith.addf %19, %20 : vector<8x8xf32>
    %cst_13 = arith.constant dense<0xFF800000> : vector<8xf32>
    %22 = vector.multi_reduction <maximumf>, %21, %cst_13 [1] : vector<8x8xf32> to vector<8xf32>
    %23 = vector.shape_cast %22 : vector<8xf32> to vector<8x1xf32>
    %24 = vector.broadcast %23 : vector<8x1xf32> to vector<8x8xf32>
    %25 = arith.subf %21, %24 : vector<8x8xf32>
    %26 = math.exp %25 : vector<8x8xf32>
    %cst_14 = arith.constant dense<0.000000e+00> : vector<8xf32>
    %27 = vector.multi_reduction <add>, %26, %cst_14 [1] : vector<8x8xf32> to vector<8xf32>
    %28 = vector.shape_cast %27 : vector<8xf32> to vector<8x1xf32>
    %29 = tpu.reciprocal %28 {approx = true} : vector<8x1xf32> -> vector<8x1xf32>
    %30 = vector.broadcast %29 : vector<8x1xf32> to vector<8x8xf32>
    %31 = arith.mulf %26, %30 : vector<8x8xf32>
    %32 = arith.truncf %31 : vector<8x8xf32> to vector<8x8xbf16>
    %cst_15 = arith.constant dense<0.000000e+00> : vector<8x8xf32>
    %33 = tpu.matmul %32, %18, %cst_15 {dimension_numbers = #tpu.dot_dimension_numbers<[1], [0], [0], [1], [0, 0, 1, 1], [], []>} : vector<8x8xbf16>, vector<8x8xbf16>, vector<8x8xf32> -> vector<8x8xf32>
    %34 = vector.extract_strided_slice %13 {offsets = [0, 8], sizes = [8, 8], strides = [1, 1]} : vector<16x96xbf16> to vector<8x8xbf16>
    %35 = vector.extract_strided_slice %13 {offsets = [0, 40], sizes = [8, 8], strides = [1, 1]} : vector<16x96xbf16> to vector<8x8xbf16>
    %36 = vector.extract_strided_slice %13 {offsets = [0, 72], sizes = [8, 8], strides = [1, 1]} : vector<16x96xbf16> to vector<8x8xbf16>
    %cst_16 = arith.constant dense<0.000000e+00> : vector<8x8xf32>
    %37 = tpu.matmul %34, %35, %cst_16 {dimension_numbers = #tpu.dot_dimension_numbers<[1], [1], [0], [0], [0, 0, 1, 0], [], []>} : vector<8x8xbf16>, vector<8x8xbf16>, vector<8x8xf32> -> vector<8x8xf32>
    %38 = vector.broadcast %15 : vector<1x8xf32> to vector<8x8xf32>
    %39 = arith.addf %37, %38 : vector<8x8xf32>
    %cst_17 = arith.constant dense<0xFF800000> : vector<8xf32>
    %40 = vector.multi_reduction <maximumf>, %39, %cst_17 [1] : vector<8x8xf32> to vector<8xf32>
    %41 = vector.shape_cast %40 : vector<8xf32> to vector<8x1xf32>
    %42 = vector.broadcast %41 : vector<8x1xf32> to vector<8x8xf32>
    %43 = arith.subf %39, %42 : vector<8x8xf32>
    %44 = math.exp %43 : vector<8x8xf32>
    %cst_18 = arith.constant dense<0.000000e+00> : vector<8xf32>
    %45 = vector.multi_reduction <add>, %44, %cst_18 [1] : vector<8x8xf32> to vector<8xf32>
    %46 = vector.shape_cast %45 : vector<8xf32> to vector<8x1xf32>
    %47 = tpu.reciprocal %46 {approx = true} : vector<8x1xf32> -> vector<8x1xf32>
    %48 = vector.broadcast %47 : vector<8x1xf32> to vector<8x8xf32>
    %49 = arith.mulf %44, %48 : vector<8x8xf32>
    %50 = arith.truncf %49 : vector<8x8xf32> to vector<8x8xbf16>
    %cst_19 = arith.constant dense<0.000000e+00> : vector<8x8xf32>
    %51 = tpu.matmul %50, %36, %cst_19 {dimension_numbers = #tpu.dot_dimension_numbers<[1], [0], [0], [1], [0, 0, 1, 1], [], []>} : vector<8x8xbf16>, vector<8x8xbf16>, vector<8x8xf32> -> vector<8x8xf32>
    %52 = tpu.concatenate %33, %51 in 1 : vector<8x8xf32>, vector<8x8xf32> -> vector<8x16xf32>
    %53 = arith.truncf %52 : vector<8x16xf32> to vector<8x16xbf16>
    %c0_20 = arith.constant 0 : index
    %c0_21 = arith.constant 0 : index
    %c0_22 = arith.constant 0 : index
    %54 = vector.load %arg20[%c0_20, %c0_21, %c0_22] : memref<2x8x32xbf16, #tpu.memory_space<vmem>>, vector<1x8x16xbf16>
    %55 = vector.shape_cast %54 : vector<1x8x16xbf16> to vector<8x16xbf16>
    %56 = vector.shape_cast %53 : vector<8x16xbf16> to vector<1x8x16xbf16>
    tpu.vector_store %arg20[%c0_20, %c0_21, %c0_22], %56 {strides = array<i32>} : memref<2x8x32xbf16, #tpu.memory_space<vmem>>, vector<1x8x16xbf16>,
    %57 = vector.extract_strided_slice %13 {offsets = [0, 16], sizes = [8, 8], strides = [1, 1]} : vector<16x96xbf16> to vector<8x8xbf16>
    %58 = vector.extract_strided_slice %13 {offsets = [0, 48], sizes = [8, 8], strides = [1, 1]} : vector<16x96xbf16> to vector<8x8xbf16>
    %59 = vector.extract_strided_slice %13 {offsets = [0, 80], sizes = [8, 8], strides = [1, 1]} : vector<16x96xbf16> to vector<8x8xbf16>
    %cst_23 = arith.constant dense<0.000000e+00> : vector<8x8xf32>
    %60 = tpu.matmul %57, %58, %cst_23 {dimension_numbers = #tpu.dot_dimension_numbers<[1], [1], [0], [0], [0, 0, 1, 0], [], []>} : vector<8x8xbf16>, vector<8x8xbf16>, vector<8x8xf32> -> vector<8x8xf32>
    %61 = vector.broadcast %15 : vector<1x8xf32> to vector<8x8xf32>
    %62 = arith.addf %60, %61 : vector<8x8xf32>
    %cst_24 = arith.constant dense<0xFF800000> : vector<8xf32>
    %63 = vector.multi_reduction <maximumf>, %62, %cst_24 [1] : vector<8x8xf32> to vector<8xf32>
    %64 = vector.shape_cast %63 : vector<8xf32> to vector<8x1xf32>
    %65 = vector.broadcast %64 : vector<8x1xf32> to vector<8x8xf32>
    %66 = arith.subf %62, %65 : vector<8x8xf32>
    %67 = math.exp %66 : vector<8x8xf32>
    %cst_25 = arith.constant dense<0.000000e+00> : vector<8xf32>
    %68 = vector.multi_reduction <add>, %67, %cst_25 [1] : vector<8x8xf32> to vector<8xf32>
    %69 = vector.shape_cast %68 : vector<8xf32> to vector<8x1xf32>
    %70 = tpu.reciprocal %69 {approx = true} : vector<8x1xf32> -> vector<8x1xf32>
    %71 = vector.broadcast %70 : vector<8x1xf32> to vector<8x8xf32>
    %72 = arith.mulf %67, %71 : vector<8x8xf32>
    %73 = arith.truncf %72 : vector<8x8xf32> to vector<8x8xbf16>
    %cst_26 = arith.constant dense<0.000000e+00> : vector<8x8xf32>
    %74 = tpu.matmul %73, %59, %cst_26 {dimension_numbers = #tpu.dot_dimension_numbers<[1], [0], [0], [1], [0, 0, 1, 1], [], []>} : vector<8x8xbf16>, vector<8x8xbf16>, vector<8x8xf32> -> vector<8x8xf32>
    %75 = vector.extract_strided_slice %13 {offsets = [0, 24], sizes = [8, 8], strides = [1, 1]} : vector<16x96xbf16> to vector<8x8xbf16>
    %76 = vector.extract_strided_slice %13 {offsets = [0, 56], sizes = [8, 8], strides = [1, 1]} : vector<16x96xbf16> to vector<8x8xbf16>
    %77 = vector.extract_strided_slice %13 {offsets = [0, 88], sizes = [8, 8], strides = [1, 1]} : vector<16x96xbf16> to vector<8x8xbf16>
    %cst_27 = arith.constant dense<0.000000e+00> : vector<8x8xf32>
    %78 = tpu.matmul %75, %76, %cst_27 {dimension_numbers = #tpu.dot_dimension_numbers<[1], [1], [0], [0], [0, 0, 1, 0], [], []>} : vector<8x8xbf16>, vector<8x8xbf16>, vector<8x8xf32> -> vector<8x8xf32>
    %79 = vector.broadcast %15 : vector<1x8xf32> to vector<8x8xf32>
    %80 = arith.addf %78, %79 : vector<8x8xf32>
    %cst_28 = arith.constant dense<0xFF800000> : vector<8xf32>
    %81 = vector.multi_reduction <maximumf>, %80, %cst_28 [1] : vector<8x8xf32> to vector<8xf32>
    %82 = vector.shape_cast %81 : vector<8xf32> to vector<8x1xf32>
    %83 = vector.broadcast %82 : vector<8x1xf32> to vector<8x8xf32>
    %84 = arith.subf %80, %83 : vector<8x8xf32>
    %85 = math.exp %84 : vector<8x8xf32>
    %cst_29 = arith.constant dense<0.000000e+00> : vector<8xf32>
    %86 = vector.multi_reduction <add>, %85, %cst_29 [1] : vector<8x8xf32> to vector<8xf32>
    %87 = vector.shape_cast %86 : vector<8xf32> to vector<8x1xf32>
    %88 = tpu.reciprocal %87 {approx = true} : vector<8x1xf32> -> vector<8x1xf32>
    %89 = vector.broadcast %88 : vector<8x1xf32> to vector<8x8xf32>
    %90 = arith.mulf %85, %89 : vector<8x8xf32>
    %91 = arith.truncf %90 : vector<8x8xf32> to vector<8x8xbf16>
    %cst_30 = arith.constant dense<0.000000e+00> : vector<8x8xf32>
    %92 = tpu.matmul %91, %77, %cst_30 {dimension_numbers = #tpu.dot_dimension_numbers<[1], [0], [0], [1], [0, 0, 1, 1], [], []>} : vector<8x8xbf16>, vector<8x8xbf16>, vector<8x8xf32> -> vector<8x8xf32>
    %93 = tpu.concatenate %74, %92 in 1 : vector<8x8xf32>, vector<8x8xf32> -> vector<8x16xf32>
    %94 = arith.truncf %93 : vector<8x16xf32> to vector<8x16xbf16>
    %c0_31 = arith.constant 0 : index
    %c0_32 = arith.constant 0 : index
    %c16 = arith.constant 16 : index
    %95 = vector.load %arg20[%c0_31, %c0_32, %c16] : memref<2x8x32xbf16, #tpu.memory_space<vmem>>, vector<1x8x16xbf16>
    %96 = vector.shape_cast %95 : vector<1x8x16xbf16> to vector<8x16xbf16>
    %97 = vector.shape_cast %94 : vector<8x16xbf16> to vector<1x8x16xbf16>
    tpu.vector_store %arg20[%c0_31, %c0_32, %c16], %97 {strides = array<i32>} : memref<2x8x32xbf16, #tpu.memory_space<vmem>>, vector<1x8x16xbf16>,
    %c1 = arith.constant 1 : index
    %c0_33 = arith.constant 0 : index
    %c0_34 = arith.constant 0 : index
    %98 = vector.load %arg4[%c1, %c0_33, %c0_34] : memref<2x1x8xf32, #tpu.memory_space<vmem>>, vector<1x1x8xf32>
    %99 = vector.shape_cast %98 : vector<1x1x8xf32> to vector<1x8xf32>
    %100 = vector.extract_strided_slice %13 {offsets = [8, 0], sizes = [8, 8], strides = [1, 1]} : vector<16x96xbf16> to vector<8x8xbf16>
    %101 = vector.extract_strided_slice %13 {offsets = [8, 32], sizes = [8, 8], strides = [1, 1]} : vector<16x96xbf16> to vector<8x8xbf16>
    %102 = vector.extract_strided_slice %13 {offsets = [8, 64], sizes = [8, 8], strides = [1, 1]} : vector<16x96xbf16> to vector<8x8xbf16>
    %cst_35 = arith.constant dense<0.000000e+00> : vector<8x8xf32>
    %103 = tpu.matmul %100, %101, %cst_35 {dimension_numbers = #tpu.dot_dimension_numbers<[1], [1], [0], [0], [0, 0, 1, 0], [], []>} : vector<8x8xbf16>, vector<8x8xbf16>, vector<8x8xf32> -> vector<8x8xf32>
    %104 = vector.broadcast %99 : vector<1x8xf32> to vector<8x8xf32>
    %105 = arith.addf %103, %104 : vector<8x8xf32>
    %cst_36 = arith.constant dense<0xFF800000> : vector<8xf32>
    %106 = vector.multi_reduction <maximumf>, %105, %cst_36 [1] : vector<8x8xf32> to vector<8xf32>
    %107 = vector.shape_cast %106 : vector<8xf32> to vector<8x1xf32>
    %108 = vector.broadcast %107 : vector<8x1xf32> to vector<8x8xf32>
    %109 = arith.subf %105, %108 : vector<8x8xf32>
    %110 = math.exp %109 : vector<8x8xf32>
    %cst_37 = arith.constant dense<0.000000e+00> : vector<8xf32>
    %111 = vector.multi_reduction <add>, %110, %cst_37 [1] : vector<8x8xf32> to vector<8xf32>
    %112 = vector.shape_cast %111 : vector<8xf32> to vector<8x1xf32>
    %113 = tpu.reciprocal %112 {approx = true} : vector<8x1xf32> -> vector<8x1xf32>
    %114 = vector.broadcast %113 : vector<8x1xf32> to vector<8x8xf32>
    %115 = arith.mulf %110, %114 : vector<8x8xf32>
    %116 = arith.truncf %115 : vector<8x8xf32> to vector<8x8xbf16>
    %cst_38 = arith.constant dense<0.000000e+00> : vector<8x8xf32>
    %117 = tpu.matmul %116, %102, %cst_38 {dimension_numbers = #tpu.dot_dimension_numbers<[1], [0], [0], [1], [0, 0, 1, 1], [], []>} : vector<8x8xbf16>, vector<8x8xbf16>, vector<8x8xf32> -> vector<8x8xf32>
    %118 = vector.extract_strided_slice %13 {offsets = [8, 8], sizes = [8, 8], strides = [1, 1]} : vector<16x96xbf16> to vector<8x8xbf16>
    %119 = vector.extract_strided_slice %13 {offsets = [8, 40], sizes = [8, 8], strides = [1, 1]} : vector<16x96xbf16> to vector<8x8xbf16>
    %120 = vector.extract_strided_slice %13 {offsets = [8, 72], sizes = [8, 8], strides = [1, 1]} : vector<16x96xbf16> to vector<8x8xbf16>
    %cst_39 = arith.constant dense<0.000000e+00> : vector<8x8xf32>
    %121 = tpu.matmul %118, %119, %cst_39 {dimension_numbers = #tpu.dot_dimension_numbers<[1], [1], [0], [0], [0, 0, 1, 0], [], []>} : vector<8x8xbf16>, vector<8x8xbf16>, vector<8x8xf32> -> vector<8x8xf32>
    %122 = vector.broadcast %99 : vector<1x8xf32> to vector<8x8xf32>
    %123 = arith.addf %121, %122 : vector<8x8xf32>
    %cst_40 = arith.constant dense<0xFF800000> : vector<8xf32>
    %124 = vector.multi_reduction <maximumf>, %123, %cst_40 [1] : vector<8x8xf32> to vector<8xf32>
    %125 = vector.shape_cast %124 : vector<8xf32> to vector<8x1xf32>
    %126 = vector.broadcast %125 : vector<8x1xf32> to vector<8x8xf32>
    %127 = arith.subf %123, %126 : vector<8x8xf32>
    %128 = math.exp %127 : vector<8x8xf32>
    %cst_41 = arith.constant dense<0.000000e+00> : vector<8xf32>
    %129 = vector.multi_reduction <add>, %128, %cst_41 [1] : vector<8x8xf32> to vector<8xf32>
    %130 = vector.shape_cast %129 : vector<8xf32> to vector<8x1xf32>
    %131 = tpu.reciprocal %130 {approx = true} : vector<8x1xf32> -> vector<8x1xf32>
    %132 = vector.broadcast %131 : vector<8x1xf32> to vector<8x8xf32>
    %133 = arith.mulf %128, %132 : vector<8x8xf32>
    %134 = arith.truncf %133 : vector<8x8xf32> to vector<8x8xbf16>
    %cst_42 = arith.constant dense<0.000000e+00> : vector<8x8xf32>
    %135 = tpu.matmul %134, %120, %cst_42 {dimension_numbers = #tpu.dot_dimension_numbers<[1], [0], [0], [1], [0, 0, 1, 1], [], []>} : vector<8x8xbf16>, vector<8x8xbf16>, vector<8x8xf32> -> vector<8x8xf32>
    %136 = tpu.concatenate %117, %135 in 1 : vector<8x8xf32>, vector<8x8xf32> -> vector<8x16xf32>
    %137 = arith.truncf %136 : vector<8x16xf32> to vector<8x16xbf16>
    %c1_43 = arith.constant 1 : index
    %c0_44 = arith.constant 0 : index
    %c0_45 = arith.constant 0 : index
    %138 = vector.load %arg20[%c1_43, %c0_44, %c0_45] : memref<2x8x32xbf16, #tpu.memory_space<vmem>>, vector<1x8x16xbf16>
    %139 = vector.shape_cast %138 : vector<1x8x16xbf16> to vector<8x16xbf16>
    %140 = vector.shape_cast %137 : vector<8x16xbf16> to vector<1x8x16xbf16>
    tpu.vector_store %arg20[%c1_43, %c0_44, %c0_45], %140 {strides = array<i32>} : memref<2x8x32xbf16, #tpu.memory_space<vmem>>, vector<1x8x16xbf16>,
    %141 = vector.extract_strided_slice %13 {offsets = [8, 16], sizes = [8, 8], strides = [1, 1]} : vector<16x96xbf16> to vector<8x8xbf16>
    %142 = vector.extract_strided_slice %13 {offsets = [8, 48], sizes = [8, 8], strides = [1, 1]} : vector<16x96xbf16> to vector<8x8xbf16>
    %143 = vector.extract_strided_slice %13 {offsets = [8, 80], sizes = [8, 8], strides = [1, 1]} : vector<16x96xbf16> to vector<8x8xbf16>
    %cst_46 = arith.constant dense<0.000000e+00> : vector<8x8xf32>
    %144 = tpu.matmul %141, %142, %cst_46 {dimension_numbers = #tpu.dot_dimension_numbers<[1], [1], [0], [0], [0, 0, 1, 0], [], []>} : vector<8x8xbf16>, vector<8x8xbf16>, vector<8x8xf32> -> vector<8x8xf32>
    %145 = vector.broadcast %99 : vector<1x8xf32> to vector<8x8xf32>
    %146 = arith.addf %144, %145 : vector<8x8xf32>
    %cst_47 = arith.constant dense<0xFF800000> : vector<8xf32>
    %147 = vector.multi_reduction <maximumf>, %146, %cst_47 [1] : vector<8x8xf32> to vector<8xf32>
    %148 = vector.shape_cast %147 : vector<8xf32> to vector<8x1xf32>
    %149 = vector.broadcast %148 : vector<8x1xf32> to vector<8x8xf32>
    %150 = arith.subf %146, %149 : vector<8x8xf32>
    %151 = math.exp %150 : vector<8x8xf32>
    %cst_48 = arith.constant dense<0.000000e+00> : vector<8xf32>
    %152 = vector.multi_reduction <add>, %151, %cst_48 [1] : vector<8x8xf32> to vector<8xf32>
    %153 = vector.shape_cast %152 : vector<8xf32> to vector<8x1xf32>
    %154 = tpu.reciprocal %153 {approx = true} : vector<8x1xf32> -> vector<8x1xf32>
    %155 = vector.broadcast %154 : vector<8x1xf32> to vector<8x8xf32>
    %156 = arith.mulf %151, %155 : vector<8x8xf32>
    %157 = arith.truncf %156 : vector<8x8xf32> to vector<8x8xbf16>
    %cst_49 = arith.constant dense<0.000000e+00> : vector<8x8xf32>
    %158 = tpu.matmul %157, %143, %cst_49 {dimension_numbers = #tpu.dot_dimension_numbers<[1], [0], [0], [1], [0, 0, 1, 1], [], []>} : vector<8x8xbf16>, vector<8x8xbf16>, vector<8x8xf32> -> vector<8x8xf32>
    %159 = vector.extract_strided_slice %13 {offsets = [8, 24], sizes = [8, 8], strides = [1, 1]} : vector<16x96xbf16> to vector<8x8xbf16>
    %160 = vector.extract_strided_slice %13 {offsets = [8, 56], sizes = [8, 8], strides = [1, 1]} : vector<16x96xbf16> to vector<8x8xbf16>
    %161 = vector.extract_strided_slice %13 {offsets = [8, 88], sizes = [8, 8], strides = [1, 1]} : vector<16x96xbf16> to vector<8x8xbf16>
    %cst_50 = arith.constant dense<0.000000e+00> : vector<8x8xf32>
    %162 = tpu.matmul %159, %160, %cst_50 {dimension_numbers = #tpu.dot_dimension_numbers<[1], [1], [0], [0], [0, 0, 1, 0], [], []>} : vector<8x8xbf16>, vector<8x8xbf16>, vector<8x8xf32> -> vector<8x8xf32>
    %163 = vector.broadcast %99 : vector<1x8xf32> to vector<8x8xf32>
    %164 = arith.addf %162, %163 : vector<8x8xf32>
    %cst_51 = arith.constant dense<0xFF800000> : vector<8xf32>
    %165 = vector.multi_reduction <maximumf>, %164, %cst_51 [1] : vector<8x8xf32> to vector<8xf32>
    %166 = vector.shape_cast %165 : vector<8xf32> to vector<8x1xf32>
    %167 = vector.broadcast %166 : vector<8x1xf32> to vector<8x8xf32>
    %168 = arith.subf %164, %167 : vector<8x8xf32>
    %169 = math.exp %168 : vector<8x8xf32>
    %cst_52 = arith.constant dense<0.000000e+00> : vector<8xf32>
    %170 = vector.multi_reduction <add>, %169, %cst_52 [1] : vector<8x8xf32> to vector<8xf32>
    %171 = vector.shape_cast %170 : vector<8xf32> to vector<8x1xf32>
    %172 = tpu.reciprocal %171 {approx = true} : vector<8x1xf32> -> vector<8x1xf32>
    %173 = vector.broadcast %172 : vector<8x1xf32> to vector<8x8xf32>
    %174 = arith.mulf %169, %173 : vector<8x8xf32>
    %175 = arith.truncf %174 : vector<8x8xf32> to vector<8x8xbf16>
    %cst_53 = arith.constant dense<0.000000e+00> : vector<8x8xf32>
    %176 = tpu.matmul %175, %161, %cst_53 {dimension_numbers = #tpu.dot_dimension_numbers<[1], [0], [0], [1], [0, 0, 1, 1], [], []>} : vector<8x8xbf16>, vector<8x8xbf16>, vector<8x8xf32> -> vector<8x8xf32>
    %177 = tpu.concatenate %158, %176 in 1 : vector<8x8xf32>, vector<8x8xf32> -> vector<8x16xf32>
    %178 = arith.truncf %177 : vector<8x16xf32> to vector<8x16xbf16>
    %c1_54 = arith.constant 1 : index
    %c0_55 = arith.constant 0 : index
    %c16_56 = arith.constant 16 : index
    %179 = vector.load %arg20[%c1_54, %c0_55, %c16_56] : memref<2x8x32xbf16, #tpu.memory_space<vmem>>, vector<1x8x16xbf16>
    %180 = vector.shape_cast %179 : vector<1x8x16xbf16> to vector<8x16xbf16>
    %181 = vector.shape_cast %178 : vector<8x16xbf16> to vector<1x8x16xbf16>
    tpu.vector_store %arg20[%c1_54, %c0_55, %c16_56], %181 {strides = array<i32>} : memref<2x8x32xbf16, #tpu.memory_space<vmem>>, vector<1x8x16xbf16>,
    %c0_57 = arith.constant 0 : index
    %c0_58 = arith.constant 0 : index
    %c0_59 = arith.constant 0 : index
    %182 = vector.load %arg20[%c0_57, %c0_58, %c0_59] : memref<2x8x32xbf16, #tpu.memory_space<vmem>>, vector<2x8x32xbf16>
    %183 = vector.shape_cast %182 : vector<2x8x32xbf16> to vector<16x32xbf16>
    %c0_60 = arith.constant 0 : index
    %c0_61 = arith.constant 0 : index
    %c0_62 = arith.constant 0 : index
    %184 = vector.load %arg9[%c0_60, %c0_61, %c0_62] : memref<1x32x32xbf16, #tpu.memory_space<vmem>>, vector<1x32x32xbf16>
    %185 = vector.shape_cast %184 : vector<1x32x32xbf16> to vector<32x32xbf16>
    %cst_63 = arith.constant dense<0.000000e+00> : vector<16x32xf32>
    %186 = tpu.matmul %183, %185, %cst_63 {dimension_numbers = #tpu.dot_dimension_numbers<[1], [0], [0], [1], [0, 0, 1, 1], [], []>} : vector<16x32xbf16>, vector<32x32xbf16>, vector<16x32xf32> -> vector<16x32xf32>
    %c0_64 = arith.constant 0 : index
    %c0_65 = arith.constant 0 : index
    %c0_66 = arith.constant 0 : index
    %187 = vector.load %arg10[%c0_64, %c0_65, %c0_66] : memref<1x1x32xf32, #tpu.memory_space<vmem>>, vector<1x1x32xf32>
    %188 = vector.shape_cast %187 : vector<1x1x32xf32> to vector<1x32xf32>
    %189 = vector.broadcast %188 : vector<1x32xf32> to vector<16x32xf32>
    %190 = arith.addf %186, %189 : vector<16x32xf32>
    %191 = arith.addf %4, %190 : vector<16x32xf32>
    %c0_67 = arith.constant 0 : index
    %c0_68 = arith.constant 0 : index
    %c0_69 = arith.constant 0 : index
    %192 = vector.load %arg11[%c0_67, %c0_68, %c0_69] : memref<1x1x32xf32, #tpu.memory_space<vmem>>, vector<1x1x32xf32>
    %193 = vector.shape_cast %192 : vector<1x1x32xf32> to vector<1x32xf32>
    %c0_70 = arith.constant 0 : index
    %c0_71 = arith.constant 0 : index
    %c0_72 = arith.constant 0 : index
    %194 = vector.load %arg12[%c0_70, %c0_71, %c0_72] : memref<1x1x32xf32, #tpu.memory_space<vmem>>, vector<1x1x32xf32>
    %195 = vector.shape_cast %194 : vector<1x1x32xf32> to vector<1x32xf32>
    %cst_73 = arith.constant dense<0.000000e+00> : vector<16xf32>
    %196 = vector.multi_reduction <add>, %191, %cst_73 [1] : vector<16x32xf32> to vector<16xf32>
    %197 = vector.shape_cast %196 : vector<16xf32> to vector<16x1xf32>
    %cst_74 = arith.constant 3.200000e+01 : f32
    %198 = vector.broadcast %cst_74 : f32 to vector<16x1xf32>
    %199 = arith.divf %197, %198 : vector<16x1xf32>
    %200 = vector.broadcast %199 : vector<16x1xf32> to vector<16x32xf32>
    %201 = arith.subf %191, %200 : vector<16x32xf32>
    %202 = arith.mulf %201, %201 : vector<16x32xf32>
    %cst_75 = arith.constant dense<0.000000e+00> : vector<16xf32>
    %203 = vector.multi_reduction <add>, %202, %cst_75 [1] : vector<16x32xf32> to vector<16xf32>
    %204 = vector.shape_cast %203 : vector<16xf32> to vector<16x1xf32>
    %cst_76 = arith.constant 3.200000e+01 : f32
    %205 = vector.broadcast %cst_76 : f32 to vector<16x1xf32>
    %206 = arith.divf %204, %205 : vector<16x1xf32>
    %cst_77 = arith.constant 9.99999996E-13 : f32
    %207 = vector.broadcast %cst_77 : f32 to vector<16x1xf32>
    %208 = arith.addf %206, %207 : vector<16x1xf32>
    %209 = math.rsqrt %208 : vector<16x1xf32>
    %210 = vector.broadcast %209 : vector<16x1xf32> to vector<16x32xf32>
    %211 = arith.mulf %201, %210 : vector<16x32xf32>
    %212 = vector.broadcast %193 : vector<1x32xf32> to vector<16x32xf32>
    %213 = arith.mulf %211, %212 : vector<16x32xf32>
    %214 = vector.broadcast %195 : vector<1x32xf32> to vector<16x32xf32>
    %215 = arith.addf %213, %214 : vector<16x32xf32>
    %216 = arith.truncf %215 : vector<16x32xf32> to vector<16x32xbf16>
    %cst_78 = arith.constant 0.000000e+00 : f32
    %217 = vector.broadcast %cst_78 : f32 to vector<16x32xf32>
    %c0_79 = arith.constant 0 : index
    %c0_80 = arith.constant 0 : index
    %c0_81 = arith.constant 0 : index
    %218 = vector.load %arg13[%c0_79, %c0_80, %c0_81] : memref<1x32x64xbf16, #tpu.memory_space<vmem>>, vector<1x32x64xbf16>
    %219 = vector.shape_cast %218 : vector<1x32x64xbf16> to vector<32x64xbf16>
    %cst_82 = arith.constant dense<0.000000e+00> : vector<16x64xf32>
    %220 = tpu.matmul %216, %219, %cst_82 {dimension_numbers = #tpu.dot_dimension_numbers<[1], [0], [0], [1], [0, 0, 1, 1], [], []>} : vector<16x32xbf16>, vector<32x64xbf16>, vector<16x64xf32> -> vector<16x64xf32>
    %c0_83 = arith.constant 0 : index
    %c0_84 = arith.constant 0 : index
    %c0_85 = arith.constant 0 : index
    %221 = vector.load %arg14[%c0_83, %c0_84, %c0_85] : memref<1x1x64xf32, #tpu.memory_space<vmem>>, vector<1x1x64xf32>
    %222 = vector.shape_cast %221 : vector<1x1x64xf32> to vector<1x64xf32>
    %223 = vector.broadcast %222 : vector<1x64xf32> to vector<16x64xf32>
    %224 = arith.addf %220, %223 : vector<16x64xf32>
    %225 = arith.mulf %224, %224 : vector<16x64xf32>
    %226 = arith.mulf %224, %225 : vector<16x64xf32>
    %cst_86 = arith.constant 4.471500e-02 : f32
    %227 = vector.broadcast %cst_86 : f32 to vector<16x64xf32>
    %228 = arith.mulf %227, %226 : vector<16x64xf32>
    %229 = arith.addf %224, %228 : vector<16x64xf32>
    %cst_87 = arith.constant 0.797884583 : f32
    %230 = vector.broadcast %cst_87 : f32 to vector<16x64xf32>
    %231 = arith.mulf %230, %229 : vector<16x64xf32>
    %232 = math.tanh %231 : vector<16x64xf32>
    %cst_88 = arith.constant 1.000000e+00 : f32
    %233 = vector.broadcast %cst_88 : f32 to vector<16x64xf32>
    %234 = arith.addf %233, %232 : vector<16x64xf32>
    %cst_89 = arith.constant 5.000000e-01 : f32
    %235 = vector.broadcast %cst_89 : f32 to vector<16x64xf32>
    %236 = arith.mulf %235, %234 : vector<16x64xf32>
    %237 = arith.mulf %224, %236 : vector<16x64xf32>
    %238 = arith.truncf %237 : vector<16x64xf32> to vector<16x64xbf16>
    %c0_90 = arith.constant 0 : index
    %c0_91 = arith.constant 0 : index
    %c0_92 = arith.constant 0 : index
    %239 = vector.load %arg15[%c0_90, %c0_91, %c0_92] : memref<1x64x32xbf16, #tpu.memory_space<vmem>>, vector<1x64x32xbf16>
    %240 = vector.shape_cast %239 : vector<1x64x32xbf16> to vector<64x32xbf16>
    %cst_93 = arith.constant dense<0.000000e+00> : vector<16x32xf32>
    %241 = tpu.matmul %238, %240, %cst_93 {dimension_numbers = #tpu.dot_dimension_numbers<[1], [0], [0], [1], [0, 0, 1, 1], [], []>} : vector<16x64xbf16>, vector<64x32xbf16>, vector<16x32xf32> -> vector<16x32xf32>
    %242 = arith.addf %217, %241 : vector<16x32xf32>
    %c0_94 = arith.constant 0 : index
    %c0_95 = arith.constant 0 : index
    %c0_96 = arith.constant 0 : index
    %243 = vector.load %arg16[%c0_94, %c0_95, %c0_96] : memref<1x1x32xf32, #tpu.memory_space<vmem>>, vector<1x1x32xf32>
    %244 = vector.shape_cast %243 : vector<1x1x32xf32> to vector<1x32xf32>
    %245 = vector.broadcast %244 : vector<1x32xf32> to vector<16x32xf32>
    %246 = arith.addf %242, %245 : vector<16x32xf32>
    %247 = arith.addf %215, %246 : vector<16x32xf32>
    %c0_97 = arith.constant 0 : index
    %c0_98 = arith.constant 0 : index
    %c0_99 = arith.constant 0 : index
    %248 = vector.load %arg17[%c0_97, %c0_98, %c0_99] : memref<1x1x32xf32, #tpu.memory_space<vmem>>, vector<1x1x32xf32>
    %249 = vector.shape_cast %248 : vector<1x1x32xf32> to vector<1x32xf32>
    %c0_100 = arith.constant 0 : index
    %c0_101 = arith.constant 0 : index
    %c0_102 = arith.constant 0 : index
    %250 = vector.load %arg18[%c0_100, %c0_101, %c0_102] : memref<1x1x32xf32, #tpu.memory_space<vmem>>, vector<1x1x32xf32>
    %251 = vector.shape_cast %250 : vector<1x1x32xf32> to vector<1x32xf32>
    %cst_103 = arith.constant dense<0.000000e+00> : vector<16xf32>
    %252 = vector.multi_reduction <add>, %247, %cst_103 [1] : vector<16x32xf32> to vector<16xf32>
    %253 = vector.shape_cast %252 : vector<16xf32> to vector<16x1xf32>
    %cst_104 = arith.constant 3.200000e+01 : f32
    %254 = vector.broadcast %cst_104 : f32 to vector<16x1xf32>
    %255 = arith.divf %253, %254 : vector<16x1xf32>
    %256 = vector.broadcast %255 : vector<16x1xf32> to vector<16x32xf32>
    %257 = arith.subf %247, %256 : vector<16x32xf32>
    %258 = arith.mulf %257, %257 : vector<16x32xf32>
    %cst_105 = arith.constant dense<0.000000e+00> : vector<16xf32>
    %259 = vector.multi_reduction <add>, %258, %cst_105 [1] : vector<16x32xf32> to vector<16xf32>
    %260 = vector.shape_cast %259 : vector<16xf32> to vector<16x1xf32>
    %cst_106 = arith.constant 3.200000e+01 : f32
    %261 = vector.broadcast %cst_106 : f32 to vector<16x1xf32>
    %262 = arith.divf %260, %261 : vector<16x1xf32>
    %cst_107 = arith.constant 9.99999996E-13 : f32
    %263 = vector.broadcast %cst_107 : f32 to vector<16x1xf32>
    %264 = arith.addf %262, %263 : vector<16x1xf32>
    %265 = math.rsqrt %264 : vector<16x1xf32>
    %266 = vector.broadcast %265 : vector<16x1xf32> to vector<16x32xf32>
    %267 = arith.mulf %257, %266 : vector<16x32xf32>
    %268 = vector.broadcast %249 : vector<1x32xf32> to vector<16x32xf32>
    %269 = arith.mulf %267, %268 : vector<16x32xf32>
    %270 = vector.broadcast %251 : vector<1x32xf32> to vector<16x32xf32>
    %271 = arith.addf %269, %270 : vector<16x32xf32>
    %272 = vector.shape_cast %271 : vector<16x32xf32> to vector<2x8x32xf32>
    %c0_108 = arith.constant 0 : index
    %c0_109 = arith.constant 0 : index
    %c0_110 = arith.constant 0 : index
    %273 = vector.load %arg19[%c0_108, %c0_109, %c0_110] : memref<2x8x32xf32, #tpu.memory_space<vmem>>, vector<2x8x32xf32>
    tpu.vector_store %arg19[%c0_108, %c0_109, %c0_110], %272 {strides = array<i32>} : memref<2x8x32xf32, #tpu.memory_space<vmem>>, vector<2x8x32xf32>,
    return
  }
  func.func @transform_0(%arg0: i32, %arg1: i32) -> (i32, i32, i32) {
    %c0_i32 = arith.constant 0 : i32
    %c0_i32_0 = arith.constant 0 : i32
    %c0_i32_1 = arith.constant 0 : i32
    return %arg0, %c0_i32, %c0_i32_0 : i32, i32, i32
  }
  func.func @transform_1(%arg0: i32, %arg1: i32) -> (i32, i32) {
    %c0_i32 = arith.constant 0 : i32
    %c0_i32_0 = arith.constant 0 : i32
    %c0_i32_1 = arith.constant 0 : i32
    return %c0_i32, %c0_i32_0 : i32, i32
  }
  func.func @transform_2(%arg0: i32, %arg1: i32) -> (i32, i32, i32) {
    %c0_i32 = arith.constant 0 : i32
    %c0_i32_0 = arith.constant 0 : i32
    %c0_i32_1 = arith.constant 0 : i32
    return %arg0, %c0_i32, %c0_i32_0 : i32, i32, i32
  }
  func.func @transform_3(%arg0: i32, %arg1: i32) -> (i32, i32) {
    %c0_i32 = arith.constant 0 : i32
    %c0_i32_0 = arith.constant 0 : i32
    %c0_i32_1 = arith.constant 0 : i32
    return %c0_i32, %c0_i32_0 : i32, i32
  }
  func.func @transform_4(%arg0: i32, %arg1: i32) -> (i32, i32) {
    %c0_i32 = arith.constant 0 : i32
    %c0_i32_0 = arith.constant 0 : i32
    %c0_i32_1 = arith.constant 0 : i32
    return %c0_i32, %c0_i32_0 : i32, i32
  }
  func.func @transform_5(%arg0: i32, %arg1: i32) -> (i32, i32, i32) {
    %c0_i32 = arith.constant 0 : i32
    %c0_i32_0 = arith.constant 0 : i32
    %c0_i32_1 = arith.constant 0 : i32
    return %arg1, %c0_i32, %c0_i32_0 : i32, i32, i32
  }
  func.func @transform_6(%arg0: i32, %arg1: i32) -> (i32, i32, i32) {
    %c0_i32 = arith.constant 0 : i32
    %c0_i32_0 = arith.constant 0 : i32
    %c0_i32_1 = arith.constant 0 : i32
    return %arg1, %c0_i32, %c0_i32_0 : i32, i32, i32
  }
  func.func @transform_7(%arg0: i32, %arg1: i32) -> (i32, i32, i32) {
    %c0_i32 = arith.constant 0 : i32
    %c0_i32_0 = arith.constant 0 : i32
    %c0_i32_1 = arith.constant 0 : i32
    return %arg1, %c0_i32, %c0_i32_0 : i32, i32, i32
  }
  func.func @transform_8(%arg0: i32, %arg1: i32) -> (i32, i32, i32) {
    %c0_i32 = arith.constant 0 : i32
    %c0_i32_0 = arith.constant 0 : i32
    %c0_i32_1 = arith.constant 0 : i32
    return %arg1, %c0_i32, %c0_i32_0 : i32, i32, i32
  }
  func.func @transform_9(%arg0: i32, %arg1: i32) -> (i32, i32, i32) {
    %c0_i32 = arith.constant 0 : i32
    %c0_i32_0 = arith.constant 0 : i32
    %c0_i32_1 = arith.constant 0 : i32
    return %arg1, %c0_i32, %c0_i32_0 : i32, i32, i32
  }
  func.func @transform_10(%arg0: i32, %arg1: i32) -> (i32, i32, i32) {
    %c0_i32 = arith.constant 0 : i32
    %c0_i32_0 = arith.constant 0 : i32
    %c0_i32_1 = arith.constant 0 : i32
    return %arg1, %c0_i32, %c0_i32_0 : i32, i32, i32
  }
  func.func @transform_11(%arg0: i32, %arg1: i32) -> (i32, i32, i32) {
    %c0_i32 = arith.constant 0 : i32
    %c0_i32_0 = arith.constant 0 : i32
    %c0_i32_1 = arith.constant 0 : i32
    return %arg1, %c0_i32, %c0_i32_0 : i32, i32, i32
  }
  func.func @transform_12(%arg0: i32, %arg1: i32) -> (i32, i32, i32) {
    %c0_i32 = arith.constant 0 : i32
    %c0_i32_0 = arith.constant 0 : i32
    %c0_i32_1 = arith.constant 0 : i32
    return %arg1, %c0_i32, %c0_i32_0 : i32, i32, i32
  }
  func.func @transform_13(%arg0: i32, %arg1: i32) -> (i32, i32, i32) {
    %c0_i32 = arith.constant 0 : i32
    %c0_i32_0 = arith.constant 0 : i32
    %c0_i32_1 = arith.constant 0 : i32
    return %arg1, %c0_i32, %c0_i32_0 : i32, i32, i32
  }
  func.func @transform_14(%arg0: i32, %arg1: i32) -> (i32, i32, i32) {
    %c0_i32 = arith.constant 0 : i32
    %c0_i32_0 = arith.constant 0 : i32
    %c0_i32_1 = arith.constant 0 : i32
    return %arg1, %c0_i32, %c0_i32_0 : i32, i32, i32
  }
  func.func @transform_15(%arg0: i32, %arg1: i32) -> (i32, i32, i32) {
    %c0_i32 = arith.constant 0 : i32
    %c0_i32_0 = arith.constant 0 : i32
    %c0_i32_1 = arith.constant 0 : i32
    return %arg1, %c0_i32, %c0_i32_0 : i32, i32, i32
  }
  func.func @transform_16(%arg0: i32, %arg1: i32) -> (i32, i32, i32) {
    %c0_i32 = arith.constant 0 : i32
    %c0_i32_0 = arith.constant 0 : i32
    %c0_i32_1 = arith.constant 0 : i32
    return %arg1, %c0_i32, %c0_i32_0 : i32, i32, i32
  }
  func.func @transform_17(%arg0: i32, %arg1: i32) -> (i32, i32, i32) {
    %c0_i32 = arith.constant 0 : i32
    %c0_i32_0 = arith.constant 0 : i32
    %c0_i32_1 = arith.constant 0 : i32
    return %arg0, %c0_i32, %c0_i32_0 : i32, i32, i32
  }
}

</mosaic_0001>

<bundles_post_ra>
// kernel: tpu_custom_call.1
= control target key start
LH: loop header
LB: loop body
LE: loop exit
PB: predicated region body
PF: predicated region fallthrough
CT: control target
= control target key end

     0   :  { %s3009_s0 = inlined_call_operand.hbm [shape: f32[2,8,32], index: 0, kind: input, shape index: {}]   ;;  %s3010_s1 = inlined_call_operand.hbm [shape: f32[8,32], index: 1, kind: input, shape index: {}]   ;;  %s3011_s2 = inlined_call_operand.hbm [shape: f32[2,1,8], index: 2, kind: input, shape index: {}]   ;;  %s3012_s3 = inlined_call_operand.vmem [shape: f32[1,32], index: 3, kind: input, shape index: {}]   ;;  %s3013_s4 = inlined_call_operand.hbm [shape: f32[1,32], index: 4, kind: input, shape index: {}]   ;;  %s3014_s5 = inlined_call_operand.vmem [shape: bf16[2,32,96], index: 5, kind: input, shape index: {}]   ;;  %s3015_s6 = inlined_call_operand.vmem [shape: f32[2,1,96], index: 6, kind: input, shape index: {}]   ;;  %s3016_s7 = inlined_call_operand.vmem [shape: bf16[2,32,32], index: 7, kind: input, shape index: {}]   ;;  %s3017_s8 = inlined_call_operand.vmem [shape: f32[2,1,32], index: 8, kind: input, shape index: {}]   ;;  %s3018_s9 = inlined_call_operand.vmem [shape: f32[2,1,32], index: 9, kind: input, shape index: {}]   ;;  %s3019_s10 = inlined_call_operand.vmem [shape: f32[2,1,32], index: 10, kind: input, shape index: {}]   ;;  %s3020_s11 = inlined_call_operand.vmem [shape: bf16[2,32,64], index: 11, kind: input, shape index: {}]   ;;  %s3021_s12 = inlined_call_operand.vmem [shape: f32[2,1,64], index: 12, kind: input, shape index: {}]   ;;  %s3022_s13 = inlined_call_operand.vmem [shape: bf16[2,64,32], index: 13, kind: input, shape index: {}]   ;;  %s3023_s14 = inlined_call_operand.vmem [shape: f32[2,1,32], index: 14, kind: input, shape index: {}]   ;;  %s3024_s15 = inlined_call_operand.hbm [shape: f32[2,1,32], index: 15, kind: input, shape index: {}]   ;;  %s3025_s16 = inlined_call_operand.vmem [shape: f32[2,1,32], index: 16, kind: input, shape index: {}]   ;;  %s3026_s17 = inlined_call_operand.hbm [shape: f32[2,8,32], index: 17, kind: output, shape index: {}]  }
   0x1   :  { %3032 = sst [smem:[#allocation24_spill]] %s3009_s0 }
   0x2   :  { %3033 = sst [smem:[#allocation25_spill]] %s3010_s1 }
   0x3   :  { %3034 = sst [smem:[#allocation26_spill]] %s3011_s2 }
   0x4   :  { %3035 = sst [smem:[#allocation27_spill]] %s3012_s3 }
   0x5   :  { %3036 = sst [smem:[#allocation28_spill]] %s3013_s4 }
   0x6   :  { %3037 = sst [smem:[#allocation29_spill]] %s3014_s5 }
   0x7   :  { %3038 = sst [smem:[#allocation30_spill]] %s3016_s7 }
   0x8   :  { %3039 = sst [smem:[#allocation31_spill]] %s3020_s11 }
   0x9   :  { %3040 = sst [smem:[#allocation32_spill]] %s3021_s12 }
   0xa   :  { %3041 = sst [smem:[#allocation33_spill]] %s3022_s13 }
   0xb   :  { %3042 = sst [smem:[#allocation34_spill]] %s3023_s14 }
   0xc   :  { %3043 = sst [smem:[#allocation35_spill]] %s3024_s15 }
   0xd   :  { %3044 = sst [smem:[#allocation36_spill]] %s3025_s16 }
   0xe   :  { %3045 = sst [smem:[#allocation37_spill]] %s3026_s17 }
   0xf   :  { %22 = vsyncpa [#allocation4], 0 }
  0x10   :  { %23 = vsyncpa [#allocation7], 0 }
  0x11   :  { %24 = vsyncpa [#allocation10], 0 }
  0x12   :  { %25 = vsyncpa [#allocation5], 0  ;;  %s2608_s24 = smov 0   ;;  %s2610_s25 = smov 0  }
  0x13   :  { %s2612_s26 = smov 0   ;;  %s2614_s27 = smov 0  }
  0x14   :  { %s2616_s28 = smov 0   ;;  %s2618_s29 = smov 0  }
  0x15 LB: > { %3046 = sst [smem:[#allocation18_spill]] %s2475_s25  ;;  %s2639_s0 = sadd.s32 4294967295, %s2491_s29   ;;  %s2491_s29 = sphi %s2618_s29, %s31_s29   ;;  %s2487_s28 = sphi %s2616_s28, %s3081_s28   ;;  %s2483_s27 = sphi %s2614_s27, %s3080_s27   ;;  %s2479_s26 = sphi %s2612_s26, %s3079_s26   ;;  %s2475_s25 = sphi %s2610_s25, %s3078_s25   ;;  %s2471_s24 = sphi %s2608_s24, %s3077_s24  }
  0x16   : > { %3047 = sst [smem:[#allocation19_spill]] %s2479_s26  ;;  %p1947_p0 = scmp.ge.s32.totalorder %s2491_s29, 1 }
  0x17   : > { %3048 = sst [smem:[#allocation20_spill]] %s2487_s28  ;;  %p439_p1 = scmp.eq.s32.totalorder %s2639_s0, 0 }
  0x18   : > { %3049 = sst [smem:[#allocation21_spill]] %s2491_s29  ;;  %p501_p2 = scmp.lt.s32.totalorder %s2491_s29, 3 }
  0x19   : > { %s3050_s19 = sld [smem:[#allocation24_spill]]  ;;  %s2493_s21 = smov [#allocation3]  }
  0x1a   : > { %p2647_p3 = pnand %p1947_p0, %p501_p2  ;;  %s517_s22 = sshll.u32 %s2493_s21, 4  ;;  %s518_s22 = int_to_ptr.vmem [resolvable:$true] %s517_s22 }
  0x1b   : > { %s3053_s30 = sld [smem:[#allocation25_spill]]  ;;  %s2495_s16 = smov 8  }
  0x1c   : > { %p2072_p4 = pneg %p2647_p3  ;;  %s2496_s14 = smov [#allocation6]  }
  0x1d   : > { %s532_s21 = sshll.u32 %s2496_s14, 4  ;;  %s3054_s2 = sld [smem:[#allocation26_spill]]  ;;  %s533_s21 = int_to_ptr.vmem [resolvable:$true] %s532_s21 }
  0x1e   : > { %p2655_p5 = pnand %p2072_p4, %p439_p1  ;;  %s2497_s3 = smov [#allocation8]  }
  0x1f   : > { %s515_s1 = sshll.u32 %s3050_s19, 4  ;;  %s2494_s19 = smov 128   ;;  %s516_s1 = int_to_ptr.hbm [resolvable:$true] %s515_s1 }
  0x20   : > { %2075 = dma.hbm_to_vmem [thread:$0]  (!%p2655_p5), %s516_s1, 256, %s518_s22, [#allocation4], %s2494_s19, %s2494_s19, %s2495_s16  }
  0x21   : > { %s530_s18 = sshll.u32 %s3053_s30, 4  ;;  %s545_s17 = sshll.u32 %s2497_s3, 4  ;;  %s531_s18 = int_to_ptr.hbm [resolvable:$true] %s530_s18  ;;  %s546_s17 = int_to_ptr.vmem [resolvable:$true] %s545_s17 }
  0x22   : > { %2078 = dma.hbm_to_vmem [thread:$0]  (!%p2655_p5), %s531_s18, 128, %s533_s21, [#allocation7]  }
  0x23   : > { %s543_s11 = sshll.u32 %s3054_s2, 4  ;;  %s3055_s4 = sld [smem:[#allocation28_spill]]  ;;  %s544_s11 = int_to_ptr.hbm [resolvable:$true] %s543_s11 }
  0x24   : > { %s2498_s13 = smov 16   ;;  %s2499_s1 = smov 1  }
  0x25   : > { %2081 = dma.hbm_to_vmem [thread:$0]  (!%p2655_p5), %s544_s11, 32, %s546_s17, [#allocation7], %s2498_s13, %s2498_s13, %s2499_s1  }
  0x26   : > { %s2500_s22 = smov [#allocation9]   ;;  %s40_s18 = sadd.s32 1, %s2487_s28 }
  0x27   : > { %s563_s30 = sshll.u32 %s2500_s22, 4  ;;  %p41_p6 = scmp.ge.s32.totalorder %s40_s18, 2  ;;  %s564_s30 = int_to_ptr.vmem [resolvable:$true] %s563_s30 }
  0x28   : > { %p432_p7 = scmp.ne.s32.totalorder %s2479_s26, %s2475_s25  ;;  %p433_p8 = scmp.eq.s32.totalorder %s2491_s29, 0 }
  0x29   : > { %s561_s12 = sshll.u32 %s3055_s4, 4  ;;  %p438_p9 = scmp.ne.s32.totalorder %s2475_s25, %s2471_s24  ;;  %s562_s12 = int_to_ptr.hbm [resolvable:$true] %s561_s12 }
  0x2a   : > { %2084 = dma.hbm_to_vmem [thread:$0]  (!%p2655_p5), %s562_s12, 16, %s564_s30, [#allocation10]  }
  0x2b   : > { %s3083_s18 = smov (%p41_p6, %s40_s18), 0  ;;  %s425_s11 = sadd.s32 1, %s2479_s26 }
  0x2c   : > { %3056 = sst [smem:[#allocation22_spill]] %s3083_s18  ;;  %p2687_p10 = por %p439_p1, %p438_p9 }
  0x2d   : > { %s422_s21 = ssub.s32 %s2487_s28, %s3083_s18  ;;  %p434_p11 = por %p433_p8, %p432_p7 }
  0x2e   : > { %p423_p12 = scmp.eq.s32.totalorder %s422_s21, 0  ;;  %p2093_p13 = scmp.lt.s32.totalorder %s2491_s29, 2 }
  0x2f   : > { %s642_s23 = sand.u32 1, %s2491_s29   ;;  %s644_s3 = sand.u32 1, %s2479_s26  }
  0x30   : > { %s2697_s17 = scalar_select %p423_p12, %s2479_s26, %s425_s11  }
  0x31   : > { %s3059_s15 = sld [smem:[#allocation35_spill]]  ;;  %s645_s13 = scalar_lea.vmem [#allocation11], %s644_s3 }
  0x32   : > { %3058 = sst [smem:[#allocation23_spill]] %s2697_s17  ;;  %s652_s1 = sshll.u32 %s645_s13, 4  ;;  %s653_s1 = int_to_ptr.vmem [resolvable:$true] %s652_s1 }
  0x33   : > { %p2086_p0 = pnand %p2093_p13, %p434_p11  ;;  %s643_s22 = scalar_lea.sflag [#allocation4], %s642_s23 }
  0x35   : > { %667 = sbr.rel (%p2647_p3) target bundleno = 2471 (0x9a7), region = 88 }
  0x37   : > { %s648_s24 = scalar_lea.hbm %s3059_s15, %s2487_s28 }
  0x38   : > { %s650_s12 = sshll.u32 %s648_s24, 4  ;;  %s651_s12 = int_to_ptr.hbm [resolvable:$true] %s650_s12 }
  0x39   : > { %2088 = dma.hbm_to_vmem [thread:$0]  (!%p2086_p0), %s651_s12, 16, %s653_s1, %s643_s22  }
  0x3a   : > { %2450 = dma.done.wait (%p439_p1), [#allocation4], 256  }
  0x3b   : > { %2452 = vsyncadd (%p439_p1), [#allocation4], 4294967040 }
  0x3c   : > { %2454 = dma.done.wait (%p439_p1), [#allocation7], 160  }
  0x3d   : > { %2456 = vsyncadd (%p439_p1), [#allocation7], 4294967136 }
  0x3e   : > { %2458 = dma.done.wait (%p439_p1), [#allocation10], 16  }
  0x3f   : > { %2460 = vsyncadd (%p439_p1), [#allocation10], 4294967280  ;;  %s689_s20 = sand.u32 1, %s2639_s0   ;;  %s691_s30 = sand.u32 1, %s2475_s25  }
  0x40   : > { %s690_s11 = scalar_lea.sflag [#allocation4], %s689_s20  ;;  %s2719_s21 = scalar_lea.vmem [#allocation11], %s691_s30 }
  0x41   : > { %2462 = dma.done.wait (%p2687_p10), %s690_s11, 16  }
  0x42   : > { %2464 = vsyncadd (%p2687_p10), %s690_s11, 4294967280  ;;  %p781_p2 = scmp.lt.s32.totalorder %s2483_s27, 1  ;;  %s3060_s5 = sld [smem:[#allocation29_spill]] }
  0x43   : > { %s3061_s7 = sld [smem:[#allocation30_spill]]  ;;  %p1966_p1 = scmp.ne.s32.totalorder %s2483_s27, 0 }
  0x44   : > { %s2727_s23 = scalar_select %p781_p2, %s2483_s27, 1 }
  0x45   : > { %s3064_s2 = sld [smem:[#allocation33_spill]] }
  0x46   : > { %s2035_s3 = sshll.u32 %s2727_s23, 4  ;;  %s2038_s26 = sshll.u32 %s2727_s23, 5 }
  0x47   : > { %s3065_s18 = sld [smem:[#allocation34_spill]] }
  0x48   : > { %s2737_s13 = scalar_lea.vmem %s3060_s5, %s2035_s3  ;;  %s3062_s5 = sld [smem:[#allocation31_spill]] }
  0x49   : > { %s2742_s20 = scalar_lea.vmem %s3061_s7, %s2035_s3  ;;  %s3063_s7 = sld [smem:[#allocation32_spill]] }
  0x4a   : > { %s3066_s29 = sld [smem:[#allocation36_spill]] }
  0x4b   : > { %s2769_s25 = scalar_lea.vmem %s3064_s2, %s2038_s26 }
  0x4c   : > { %827 = sbr.rel (%p1966_p1) target bundleno = 361 (0x169), region = 112 }
  0x4d   : > { %s818_s16 = scalar_lea.vmem %s3065_s18, %s2727_s23 }
  0x4e   : > { %s2759_s28 = scalar_lea.vmem %s3062_s5, %s2035_s3 }
  0x4f   : > { %s810_s17 = scalar_lea.vmem %s3063_s7, %s2727_s23  ;;  %s3067_s7 = sld [smem:[#allocation27_spill]] (!%p1966_p1) }
  0x50   : > { %s821_s24 = scalar_lea.vmem %s3066_s29, %s2727_s23 }
  0x51   : > { %v828_v0 = vld [vmem:[#allocation3] sm:$0xff]  ;;  %v830_v1 = vld [vmem:[#allocation6] sm:$0xff]  ;;  %vm835_vm0 = vcmask 261120   ;;  %v829_v3 = vld [vmem:[#allocation3 + $0x8] sm:$0xff]  ;;  %v2501_v7 = vmov 32.0  }
  0x52   : > { %v831_v2 = vadd.f32 %v830_v1, %v828_v0  ;;  %v832_v5 = vadd.f32 %v830_v1, %v829_v3  ;;  %2175 = vrcp.f32 %v2501_v7  ;;  %v2174_v41 = vld [vmem:[#allocation9] ss:$0 sm:$0xff] }
  0x54   : > { %v836_v4 = vsel %vm835_vm0, %v831_v2, 0.0  ;;  %v839_v6 = vsel %vm835_vm0, %v832_v5, 0.0 }
  0x55   : > { %837 = vadd.xlane.f32.xlu0 %v836_v4  ;;  %v2173_v38 = vld [vmem:[%s3067_s7] ss:$0 sm:$0xff] }
  0x58   : > { %v2176_v8 = vpop.eup %2175 }
  0x59   : > { %v843_v9 = vmul.f32 32.0, %v2176_v8  ;;  %vm847_vm1 = vweird.f32 %v2176_v8 }
  0x5b   : > { %v844_v10 = vsub.f32 1.0, %v843_v9 }
  0x5d   : > { %840 = vadd.xlane.f32.xlu0 %v839_v6  ;;  %v845_v11 = vmul.f32 %v2176_v8, %v844_v10 }
  0x5f   : > { %v846_v12 = vadd.f32 %v2176_v8, %v845_v11 }
  0x61   : > { %v848_v13 = vsel %vm847_vm1, %v2176_v8, %v846_v12 }
  0xc8   : > { %v838_v14 = vpop.xlane.xlu0 %837 }
  0xc9   : > { %v849_v15 = vmul.f32 %v848_v13, %v838_v14 }
  0xcb   : > { %v851_v16 = vsub.f32 %v831_v2, %v849_v15 }
  0xcd   : > { %v853_v17 = vmul.f32 %v851_v16, %v851_v16 }
  0xcf   : > { %v855_v18 = vsel %vm835_vm0, %v853_v17, 0.0 }
  0xd0   : > { %856 = vadd.xlane.f32.xlu1 %v855_v18  ;;  %v841_v19 = vpop.xlane.xlu0 %840 }
  0xd1   : > { %v850_v20 = vmul.f32 %v848_v13, %v841_v19 }
  0xd3   : > { %v852_v21 = vsub.f32 %v832_v5, %v850_v20 }
  0xd5   : > { %v854_v22 = vmul.f32 %v852_v21, %v852_v21 }
  0xd7   : > { %v858_v23 = vsel %vm835_vm0, %v854_v22, 0.0 }
  0xd8   : > { %859 = vadd.xlane.f32.xlu1 %v858_v23 }
 0x143   : > { %v857_v24 = vpop.xlane.xlu1 %856 }
 0x144   : > { %v861_v25 = vmul.f32 %v857_v24, %v848_v13 }
 0x146   : > { %v863_v26 = vadd.f32 1e-12, %v861_v25 }
 0x148   : > { %2177 = vrsqrt.f32 %v863_v26  ;;  %vm871_vm3 = vweird.f32 %v863_v26 }
 0x14b   : > { %v860_v27 = vpop.xlane.xlu1 %859 }
 0x14c   : > { %v862_v28 = vmul.f32 %v860_v27, %v848_v13 }
 0x14e   : > { %v2178_v29 = vpop.eup %2177  ;;  %v864_v30 = vadd.f32 1e-12, %v862_v28 }
 0x14f   : > { %v866_v31 = vmul.f32 %v2178_v29, %v863_v26  ;;  %vm872_vm2 = vweird.f32 %v2178_v29 }
 0x150   : > { %2179 = vrsqrt.f32 %v864_v30  ;;  %vm873_vm4 = vmor %vm871_vm3, %vm872_vm2  ;;  %vm881_vm6 = vweird.f32 %v864_v30 }
 0x151   : > { %v867_v32 = vmul.f32 %v2178_v29, %v866_v31 }
 0x153   : > { %v868_v33 = vmul.f32 0.5, %v867_v32 }
 0x155   : > { %v869_v34 = vsub.f32 1.5, %v868_v33 }
 0x156   : > { %v2180_v35 = vpop.eup %2179 }
 0x157   : > { %v870_v36 = vmul.f32 %v2178_v29, %v869_v34  ;;  %v876_v37 = vmul.f32 %v2180_v35, %v864_v30  ;;  %vm882_vm5 = vweird.f32 %v2180_v35 }
 0x158   : > { %vm883_vm7 = vmor %vm881_vm6, %vm882_vm5 }
 0x159   : > { %v874_v39 = vsel %vm873_vm4, %v2178_v29, %v870_v36  ;;  %v877_v40 = vmul.f32 %v2180_v35, %v876_v37 }
 0x15a   : > { %v885_v42 = vmul.f32 %v874_v39, %v851_v16 }
 0x15b   : > { %v878_v43 = vmul.f32 0.5, %v877_v40 }
 0x15c   : > { %v890_v44 = vmul.f32 %v2173_v38, %v885_v42 }
 0x15d   : > { %v879_v45 = vsub.f32 1.5, %v878_v43 }
 0x15e   : > { %v895_v46 = vadd.f32 %v2174_v41, %v890_v44 }
 0x15f   : > { %v880_v47 = vmul.f32 %v2180_v35, %v879_v45 }
 0x160   : > { %897 = vst.msk [vmem:[#allocation12] sm:$0xff] %vm835_vm0, %v895_v46 }
 0x161   : > { %v884_v48 = vsel %vm883_vm7, %v2180_v35, %v880_v47 }
 0x162   : > { %v886_v49 = vmul.f32 %v884_v48, %v852_v21 }
 0x164   : > { %v891_v50 = vmul.f32 %v2173_v38, %v886_v49 }
 0x166   : > { %v896_v51 = vadd.f32 %v2174_v41, %v891_v50 }
 0x168   : > { %898 = vst.msk [vmem:[#allocation12 + $0x8] sm:$0xff] %vm835_vm0, %v896_v51 }
 0x169 PF: > { %v2040_v52 = vld [vmem:[%s2737_s13 + $0x8] sm:$0xff]  ;;  %v2039_v53 = vld [vmem:[%s2737_s13] sm:$0xff]  ;;  %vm922_vm8 = vcmask 261120   ;;  %s3068_s29 = scalar_lea.vmem %s3015_s6, %s2727_s23  ;;  %s2502_s18 = smov 104   ;;  %vm951_vm9 = vcmask 64512   ;;  %vm988_vm10 = vcmask 1043456  }
 0x16a   : > { %v2791_v54 = vld [vmem:[#allocation12] sm:$0xff]  ;;  %932 = vmatpush.bf16.msra.mxu0 %v2040_v52  ;;  %v2191_v57 = vld [vmem:[%s3068_s29] ss:$0 sm:$0xff]  ;;  %s2503_s3 = smov 120   ;;  %s2504_s19 = smov 96   ;;  %vm1067_vm11 = vcmask 125952  }
 0x16b   : > { %s2505_s13 = smov 88   ;;  %s2506_s12 = smov 72   ;;  %v2192_v26 = vld [vmem:[#allocation8] ss:$0 sm:$0xff]  ;;  %v2193_v44 = vld [vmem:[#allocation8 + $0x1] ss:$0 sm:$0xff] }
 0x16c   : > { %s2507_s1 = smov 112   ;;  %s2508_s22 = smov 80   ;;  %vm1191_vm12 = vcmask 257152   ;;  %vm1644_vm4 = vcmask 523264  }
 0x16d   : > { %s2509_s30 = smov 64   ;;  %s2510_s11 = smov 56  }
 0x16e   : > { %933 = vmatpush.bf16.msra.mxu0 %v2039_v53  ;;  %s2511_s4 = smov 40   ;;  %s2512_s15 = smov 48  }
 0x16f   : > { %v2793_v55 = vld [vmem:[#allocation12 + $0x8] sm:$0xff]  ;;  %s2513_s14 = smov 8   ;;  %s2514_s2 = smov 16  }
 0x170   : > { %v901_v56 = vpack.c.bf16 %v2793_v55, %v2791_v54  ;;  %s3069_s26 = scalar_lea.vmem %s3017_s8, %s2727_s23  ;;  %s3070_s27 = scalar_lea.vmem %s3018_s9, %s2727_s23 }
 0x171   : > { %p2098_p3 = scmp.eq.s32.totalorder %s2639_s0, 1 }
 0x172   : > { %1975 = vmatmul.msk.bf16.vlgmr.msra.gmra.mxu0 %vm922_vm8, %v901_v56 }
 0x1ef   : > { %v935_v58 = vpop.f32.mrf.mxu0 }
 0x1f0   : > { %v936_v59 = vadd.f32 %v2191_v57, %v935_v58 }
 0x1f2   : > { %v940_v60 = vpack.c.bf16 %v936_v59, %v936_v59 }
 0x1f4   : > { %v947_v61 = vunpack.c.l.b16 %v940_v60 }
 0x1f6   : > { %v2803_v62 = vpack.c.b16 %v947_v61, %v947_v61 }
 0x1f7   : > { %v937_v63 = vpop.f32.mrf.mxu0 }
 0x1f8   : > { %v938_v0 = vadd.f32 %v2191_v57, %v937_v63  ;;  %1125 = vrot.lane.b32.xlu2 %v2803_v62, %s2502_s18  ;;  %1005 = vrot.lane.b32.xlu1 %v2803_v62, %s2503_s3 }
 0x1f9   : > { %949 = vrot.lane.b32.xlu0 %v2803_v62, %s2504_s19 }
 0x1fa   : > { %v941_v1 = vpack.c.bf16 %v938_v0, %v938_v0 }
 0x1fc   : > { %v1199_v2 = vunpack.c.l.b16 %v941_v1 }
 0x1fe   : > { %v2808_v3 = vpack.c.b16 %v1199_v2, %v1199_v2 }
 0x200   : > { %1257 = vrot.lane.b32.xlu2 %v2808_v3, %s2505_s13  ;;  %1127 = vrot.lane.b32.xlu1 %v2803_v62, %s2506_s12 }
 0x201   : > { %1007 = vrot.lane.b32.xlu0 %v2803_v62, %s2505_s13 }
 0x208   : > { %1375 = vrot.lane.b32.xlu2 %v2808_v3, %s2502_s18  ;;  %1377 = vrot.lane.b32.xlu1 %v2808_v3, %s2506_s12 }
 0x209   : > { %1255 = vrot.lane.b32.xlu0 %v2808_v3, %s2503_s3  ;;  %s3071_s3 = scalar_lea.vmem %s3019_s10, %s2727_s23  ;;  %s3075_s23 = sld [smem:[#allocation37_spill]] }
 0x210   : > { %1201 = vrot.lane.b32.xlu2 %v2808_v3, %s2504_s19  ;;  %1069 = vrot.lane.b32.xlu1 %v2803_v62, %s2507_s1 }
 0x211   : > { %1071 = vrot.lane.b32.xlu0 %v2803_v62, %s2508_s22 }
 0x218   : > { %1319 = vrot.lane.b32.xlu1 %v2808_v3, %s2507_s1 }
 0x219   : > { %1321 = vrot.lane.b32.xlu0 %v2808_v3, %s2508_s22 }
 0x252   : > { %v1126_v4 = vpop.permute.xlu2 %1125 }
 0x25a   : > { %v1258_v8 = vpop.permute.xlu2 %1257 }
 0x25b   : > { %v1263_v15 = vsel %vm951_vm9, %v1258_v8, 0 }
 0x262   : > { %v1376_v13 = vpop.permute.xlu2 %1375 }
 0x26a   : > { %v1006_v5 = vpop.permute.xlu1 %1005  ;;  %v1202_v17 = vpop.permute.xlu2 %1201 }
 0x26b   : > { %v950_v6 = vpop.permute.xlu0 %949  ;;  %v1207_v20 = vsel %vm951_vm9, %v1202_v17, 0 }
 0x26c   : > { %v956_v7 = vsel %vm951_vm9, %v950_v6, 0 }
 0x26d   : > { %965 = vmatpush.bf16.xpose.msra.mxu1 %v956_v7 }
 0x272   : > { %v1128_v9 = vpop.permute.xlu1 %1127 }
 0x273   : > { %v1008_v10 = vpop.permute.xlu0 %1007  ;;  %v1133_v11 = vsel %vm951_vm9, %v1128_v9, 0 }
 0x274   : > { %1976 = vmatmul.msk.bf16.vlgmr.msra.gmra.mxu1 %vm951_vm9, %v940_v60  ;;  %v1013_v12 = vsel %vm951_vm9, %v1008_v10, 0 }
 0x275   : > { %1022 = vmatpush.bf16.xpose.msra.mxu3 %v1013_v12 }
 0x27a   : > { %v1378_v16 = vpop.permute.xlu1 %1377 }
 0x27b   : > { %v1256_v14 = vpop.permute.xlu0 %1255  ;;  %v1383_v23 = vsel %vm951_vm9, %v1378_v16, 0 }
 0x27c   : > { %1978 = vmatmul.msk.bf16.vlgmr.msra.gmra.mxu3 %vm951_vm9, %v1006_v5 }
 0x27d   : > { %1142 = vmatpush.bf16.xpose.msrb.mxu3 %v1133_v11 }
 0x282   : > { %v1070_v21 = vpop.permute.xlu1 %1069 }
 0x283   : > { %v1072_v18 = vpop.permute.xlu0 %1071 }
 0x284   : > { %v1077_v19 = vsel %vm951_vm9, %v1072_v18, 0 }
 0x285   : > { %1272 = vmatpush.bf16.xpose.msra.mxu3 %v1263_v15  ;;  %1086 = vmatpush.bf16.xpose.msrb.mxu0 %v1077_v19 }
 0x28a   : > { %v1320_v25 = vpop.permute.xlu1 %1319 }
 0x28b   : > { %v1322_v22 = vpop.permute.xlu0 %1321 }
 0x28c   : > { %v1327_v24 = vsel %vm951_vm9, %v1322_v22, 0  ;;  %1980 = vmatmul.msk.bf16.vlgmr.msrb.gmra.mxu0 %vm951_vm9, %v1070_v21  ;;  %1982 = vmatmul.msk.bf16.vlgmr.msrb.gmra.mxu3 %vm951_vm9, %v1126_v4 }
 0x28d   : > { %1216 = vmatpush.bf16.xpose.msra.mxu0 %v1207_v20  ;;  %1392 = vmatpush.bf16.xpose.msrb.mxu3 %v1383_v23 }
 0x295   : > { %1336 = vmatpush.bf16.xpose.msrb.mxu0 %v1327_v24 }
 0x29c   : > { %1984 = vmatmul.msk.bf16.vlgmr.msra.gmra.mxu0 %vm951_vm9, %v941_v1  ;;  %1986 = vmatmul.msk.bf16.vlgmr.msra.gmra.mxu3 %vm951_vm9, %v1256_v14 }
 0x2ac   : > { %1988 = vmatmul.msk.bf16.vlgmr.msrb.gmra.mxu0 %vm951_vm9, %v1320_v25  ;;  %1990 = vmatmul.msk.bf16.vlgmr.msrb.gmra.mxu3 %vm951_vm9, %v1376_v13 }
 0x2f1   : > { %v967_v27 = vpop.f32.mrf.mxu1 }
 0x2f2   : > { %v968_v28 = vadd.f32 %v2192_v26, %v967_v27 }
 0x2f4   : > { %v971_v29 = vsel %vm951_vm9, %v968_v28, -inf }
 0x2f5   : > { %972 = vmax.xlane.f32.xlu2 %v971_v29 }
 0x2f9   : > { %v969_v30 = vpop.f32.mrf.mxu1 }
 0x2ff   : > { %v1024_v31 = vpop.f32.mrf.mxu3 }
 0x300   : > { %v1025_v32 = vadd.f32 %v2192_v26, %v1024_v31 }
 0x302   : > { %v1028_v33 = vsel %vm951_vm9, %v1025_v32, -inf }
 0x303   : > { %1029 = vmax.xlane.f32.xlu0 %v1028_v33 }
 0x307   : > { %v1026_v34 = vpop.f32.mrf.mxu3 }
 0x309   : > { %v1088_v35 = vpop.f32.mrf.mxu0 }
 0x30a   : > { %v2839_v36 = vadd.f32 %v2192_v26, %v1088_v35 }
 0x30c   : > { %v1092_v37 = vsel %vm951_vm9, %v2839_v36, -inf }
 0x30d   : > { %1093 = vmax.xlane.f32.xlu2 %v1092_v37 }
 0x30f   : > { %v1144_v38 = vpop.f32.mrf.mxu3 }
 0x310   : > { %v1145_v39 = vadd.f32 %v2192_v26, %v1144_v38 }
 0x311   : > { %v1090_v40 = vpop.f32.mrf.mxu0 }
 0x312   : > { %v1148_v41 = vsel %vm951_vm9, %v1145_v39, -inf }
 0x313   : > { %1149 = vmax.xlane.f32.xlu1 %v1148_v41 }
 0x317   : > { %v1146_v42 = vpop.f32.mrf.mxu3  ;;  %983 = vrot.lane.b32.xlu0 %v2803_v62, %s2509_s30 }
 0x319   : > { %v1218_v43 = vpop.f32.mrf.mxu0 }
 0x31a   : > { %v1219_v58 = vadd.f32 %v2193_v44, %v1218_v43 }
 0x31c   : > { %v1222_v59 = vsel %vm951_vm9, %v1219_v58, -inf }
 0x31f   : > { %v1274_v45 = vpop.f32.mrf.mxu3 }
 0x320   : > { %v1275_v46 = vadd.f32 %v2193_v44, %v1274_v45 }
 0x321   : > { %v1220_v47 = vpop.f32.mrf.mxu0 }
 0x322   : > { %v1278_v48 = vsel %vm951_vm9, %v1275_v46, -inf }
 0x323   : > { %1279 = vmax.xlane.f32.xlu2 %v1278_v48 }
 0x327   : > { %v1276_v49 = vpop.f32.mrf.mxu3 }
 0x329   : > { %v1338_v50 = vpop.f32.mrf.mxu0 }
 0x32a   : > { %v2851_v60 = vadd.f32 %v2193_v44, %v1338_v50 }
 0x32c   : > { %1040 = vrot.lane.b32.xlu1 %v2803_v62, %s2510_s11  ;;  %v1342_v61 = vsel %vm951_vm9, %v2851_v60, -inf }
 0x32f   : > { %v1394_v51 = vpop.f32.mrf.mxu3 }
 0x330   : > { %v1395_v56 = vadd.f32 %v2193_v44, %v1394_v51 }
 0x331   : > { %v1340_v52 = vpop.f32.mrf.mxu0 }
 0x332   : > { %v1398_v57 = vsel %vm951_vm9, %v1395_v56, -inf }
 0x337   : > { %v1396_v53 = vpop.f32.mrf.mxu3 }
 0x356   : > { %1399 = vmax.xlane.f32.xlu1 %v1398_v57 }
 0x35e   : > { %1223 = vmax.xlane.f32.xlu1 %v1222_v59 }
 0x366   : > { %1343 = vmax.xlane.f32.xlu1 %v1342_v61 }
 0x368   : > { %v973_v63 = vpop.xlane.xlu2 %972 }
 0x369   : > { %v974_v0 = vsub.f32 %v968_v28, %v973_v63 }
 0x36b   : > { %v975_v1 = vmul.f32 1.442695, %v974_v0 }
 0x36d   : > { %2201 = vpow2.f32 %v975_v1 }
 0x373   : > { %v2855_v2 = vpop.eup %2201 }
 0x374   : > { %v977_v4 = vsel %vm951_vm9, %v2855_v2, 0.0 }
 0x375   : > { %978 = vadd.xlane.f32.xlu2 %v977_v4 }
 0x376   : > { %v1030_v5 = vpop.xlane.xlu0 %1029 }
 0x377   : > { %v1031_v6 = vsub.f32 %v1025_v32, %v1030_v5 }
 0x379   : > { %v1032_v7 = vmul.f32 1.442695, %v1031_v6 }
 0x37b   : > { %2203 = vpow2.f32 %v1032_v7 }
 0x37f   : > { %1410 = vrot.lane.b32.xlu1 %v2808_v3, %s2511_s4 }
 0x380   : > { %v1094_v19 = vpop.xlane.xlu2 %1093 }
 0x381   : > { %v2860_v8 = vpop.eup %2203  ;;  %v1095_v23 = vsub.f32 %v2839_v36, %v1094_v19 }
 0x382   : > { %v1034_v9 = vsel %vm951_vm9, %v2860_v8, 0.0 }
 0x383   : > { %1035 = vadd.xlane.f32.xlu2 %v1034_v9  ;;  %v1096_v24 = vmul.f32 1.442695, %v1095_v23 }
 0x386   : > { %v1150_v10 = vpop.xlane.xlu1 %1149 }
 0x387   : > { %v1151_v11 = vsub.f32 %v1145_v39, %v1150_v10 }
 0x389   : > { %v1152_v12 = vmul.f32 1.442695, %v1151_v11  ;;  %v984_v13 = vpop.permute.xlu0 %983 }
 0x38a   : > { %v990_v14 = vsel %vm988_vm10, %v984_v13, 0 }
 0x38b   : > { %2205 = vpow2.f32 %v1152_v12  ;;  %999 = vmatpush.bf16.msra.mxu2 %v990_v14 }
 0x391   : > { %v2865_v15 = vpop.eup %2205 }
 0x392   : > { %v1154_v16 = vsel %vm951_vm9, %v2865_v15, 0.0 }
 0x393   : > { %1155 = vadd.xlane.f32.xlu0 %v1154_v16 }
 0x396   : > { %v1280_v20 = vpop.xlane.xlu2 %1279 }
 0x397   : > { %v1281_v21 = vsub.f32 %v1275_v46, %v1280_v20 }
 0x399   : > { %v1282_v22 = vmul.f32 1.442695, %v1281_v21 }
 0x39b   : > { %1160 = vrot.lane.b32.xlu2 %v2803_v62, %s2511_s4  ;;  %2207 = vpow2.f32 %v1282_v22 }
 0x39c   : > { %2209 = vpow2.f32 %v1096_v24 }
 0x39e   : > { %v1041_v17 = vpop.permute.xlu1 %1040 }
 0x39f   : > { %v1046_v18 = vsel %vm988_vm10, %v1041_v17, 0 }
 0x3a0   : > { %1055 = vmatpush.bf16.msrb.mxu2 %v1046_v18 }
 0x3a1   : > { %v2208_v25 = vpop.eup %2207 }
 0x3a2   : > { %v1284_v26 = vsel %vm951_vm9, %v2208_v25, 0.0  ;;  %v2875_v27 = vpop.eup %2209 }
 0x3a3   : > { %v1098_v30 = vsel %vm951_vm9, %v2875_v27, 0.0 }
 0x3a7   : > { %1290 = vrot.lane.b32.xlu0 %v2808_v3, %s2510_s11 }
 0x3c4   : > { %1285 = vadd.xlane.f32.xlu2 %v1284_v26 }
 0x3c9   : > { %v1400_v28 = vpop.xlane.xlu1 %1399 }
 0x3ca   : > { %v1401_v29 = vsub.f32 %v1395_v56, %v1400_v28 }
 0x3cc   : > { %v1402_v31 = vmul.f32 1.442695, %v1401_v29  ;;  %1099 = vadd.xlane.f32.xlu2 %v1098_v30 }
 0x3ce   : > { %2211 = vpow2.f32 %v1402_v31 }
 0x3d1   : > { %v1224_v32 = vpop.xlane.xlu1 %1223 }
 0x3d2   : > { %v1225_v33 = vsub.f32 %v1219_v58, %v1224_v32 }
 0x3d4   : > { %v2879_v34 = vpop.eup %2211  ;;  %v1226_v35 = vmul.f32 1.442695, %v1225_v33 }
 0x3d5   : > { %v1404_v36 = vsel %vm951_vm9, %v2879_v34, 0.0 }
 0x3d6   : > { %2213 = vpow2.f32 %v1226_v35  ;;  %1405 = vadd.xlane.f32.xlu0 %v1404_v36 }
 0x3d9   : > { %v1344_v37 = vpop.xlane.xlu1 %1343 }
 0x3da   : > { %v1345_v38 = vsub.f32 %v2851_v60, %v1344_v37 }
 0x3dc   : > { %v2884_v39 = vpop.eup %2213  ;;  %v1346_v40 = vmul.f32 1.442695, %v1345_v38 }
 0x3dd   : > { %v1228_v41 = vsel %vm951_vm9, %v2884_v39, 0.0 }
 0x3de   : > { %2215 = vpow2.f32 %v1346_v40  ;;  %1229 = vadd.xlane.f32.xlu1 %v1228_v41 }
 0x3e4   : > { %v2888_v42 = vpop.eup %2215  ;;  %1104 = vrot.lane.b32.xlu2 %v2803_v62, %s2512_s15 }
 0x3e5   : > { %v1348_v43 = vsel %vm951_vm9, %v2888_v42, 0.0 }
 0x3e6   : > { %1349 = vadd.xlane.f32.xlu0 %v1348_v43 }
 0x3e8   : > { %v979_v44 = vpop.xlane.xlu2 %978 }
 0x3e9   : > { %2217 = vrcp.f32 %v979_v44 }
 0x3ec   : > { %1234 = vrot.lane.b32.xlu2 %v2808_v3, %s2509_s30 }
 0x3ef   : > { %v2218_v45 = vpop.eup %2217 }
 0x3f0   : > { %v981_v46 = vmul.f32 %v2218_v45, %v2855_v2 }
 0x3f1   : > { %v1411_v58 = vpop.permute.xlu1 %1410 }
 0x3f2   : > { %v982_v47 = vpack.c.bf16 %v981_v46, %v981_v46  ;;  %v1416_v61 = vsel %vm988_vm10, %v1411_v58, 0  ;;  %v2043_v58 = vld [vmem:[%s2742_s20 + $0x8] sm:$0xff] }
 0x3f3   : > { %1478 = vmatpush.bf16.msra.mxu0 %v2043_v58  ;;  %v2047_v58 = vld [vmem:[%s2769_s25 + $0x8] sm:$0xff] }
 0x3f4   : > { %1354 = vrot.lane.b32.xlu2 %v2808_v3, %s2512_s15  ;;  %1977 = vmatmul.msk.bf16.vlgmr.msra.gmra.mxu2 %vm951_vm9, %v982_v47 }
 0x3f6   : > { %v1036_v48 = vpop.xlane.xlu2 %1035 }
 0x3f7   : > { %2219 = vrcp.f32 %v1036_v48 }
 0x3fd   : > { %v2220_v62 = vpop.eup %2219 }
 0x3fe   : > { %v1038_v49 = vmul.f32 %v2220_v62, %v2860_v8  ;;  %v1161_v50 = vpop.permute.xlu2 %1160 }
 0x3ff   : > { %v1166_v51 = vsel %vm988_vm10, %v1161_v50, 0 }
 0x400   : > { %1175 = vmatpush.bf16.msra.mxu2 %v1166_v51  ;;  %v1039_v52 = vpack.c.bf16 %v1038_v49, %v1038_v49 }
 0x404   : > { %1979 = vmatmul.msk.bf16.vlgmr.msrb.gmra.mxu2 %vm951_vm9, %v1039_v52 }
 0x406   : > { %v1156_v53 = vpop.xlane.xlu0 %1155 }
 0x407   : > { %2221 = vrcp.f32 %v1156_v53 }
 0x40d   : > { %v2222_v56 = vpop.eup %2221 }
 0x40e   : > { %v1158_v57 = vmul.f32 %v2222_v56, %v2865_v15 }
 0x410   : > { %v1159_v3 = vpack.c.bf16 %v1158_v57, %v1158_v57 }
 0x414   : > { %1983 = vmatmul.msk.bf16.vlgmr.msra.gmra.mxu2 %vm951_vm9, %v1159_v3 }
 0x419   : > { %v1291_v59 = vpop.permute.xlu0 %1290 }
 0x41a   : > { %v1296_v60 = vsel %vm988_vm10, %v1291_v59, 0  ;;  %v2042_v59 = vld [vmem:[%s2742_s20] sm:$0xff] }
 0x41b   : > { %1305 = vmatpush.bf16.msrb.mxu2 %v1296_v60  ;;  %1479 = vmatpush.bf16.msra.mxu0 %v2042_v59  ;;  %v2197_v59 = vld [vmem:[%s810_s17] ss:$0 sm:$0xff] }
 0x41f   : > { %1425 = vmatpush.bf16.msra.mxu2 %v1416_v61 }
 0x437   : > { %v1286_v63 = vpop.xlane.xlu2 %1285 }
 0x438   : > { %2223 = vrcp.f32 %v1286_v63 }
 0x43e   : > { %v2224_v0 = vpop.eup %2223 }
 0x43f   : > { %v1288_v1 = vmul.f32 %v2224_v0, %v2208_v25  ;;  %v1100_v2 = vpop.xlane.xlu2 %1099  ;;  %v2194_v0 = vld [vmem:[%s3069_s26] ss:$0 sm:$0xff] }
 0x440   : > { %2225 = vrcp.f32 %v1100_v2 }
 0x441   : > { %v1289_v4 = vpack.c.bf16 %v1288_v1, %v1288_v1 }
 0x443   : > { %1987 = vmatmul.msk.bf16.vlgmr.msrb.gmra.mxu2 %vm951_vm9, %v1289_v4 }
 0x446   : > { %v2226_v5 = vpop.eup %2225 }
 0x447   : > { %v1102_v6 = vmul.f32 %v2226_v5, %v2875_v27  ;;  %v1105_v7 = vpop.permute.xlu2 %1104 }
 0x448   : > { %v1110_v8 = vsel %vm988_vm10, %v1105_v7, 0 }
 0x449   : > { %1119 = vmatpush.bf16.msrb.mxu1 %v1110_v8  ;;  %v1406_v9 = vpop.xlane.xlu0 %1405  ;;  %v1103_v10 = vpack.c.bf16 %v1102_v6, %v1102_v6 }
 0x44a   : > { %2227 = vrcp.f32 %v1406_v9 }
 0x44c   : > { %1981 = vmatmul.msk.bf16.vlgmr.msrb.gmra.mxu1 %vm951_vm9, %v1103_v10  ;;  %v2515_v10 = vmov 32.0  }
 0x44f   : > { %v1235_v11 = vpop.permute.xlu2 %1234 }
 0x450   : > { %v2228_v12 = vpop.eup %2227  ;;  %v1240_v13 = vsel %vm988_vm10, %v1235_v11, 0 }
 0x451   : > { %v1408_v14 = vmul.f32 %v2228_v12, %v2879_v34  ;;  %v1230_v15 = vpop.xlane.xlu1 %1229  ;;  %1249 = vmatpush.bf16.msra.mxu1 %v1240_v13 }
 0x452   : > { %2229 = vrcp.f32 %v1230_v15 }
 0x453   : > { %v1409_v16 = vpack.c.bf16 %v1408_v14, %v1408_v14 }
 0x455   : > { %1991 = vmatmul.msk.bf16.vlgmr.msra.gmra.mxu2 %vm951_vm9, %v1409_v16 }
 0x457   : > { %v1355_v17 = vpop.permute.xlu2 %1354 }
 0x458   : > { %v2230_v18 = vpop.eup %2229  ;;  %v1360_v19 = vsel %vm988_vm10, %v1355_v17, 0 }
 0x459   : > { %v1232_v20 = vmul.f32 %v2230_v18, %v2884_v39  ;;  %1369 = vmatpush.bf16.msrb.mxu1 %v1360_v19  ;;  %v1350_v22 = vpop.xlane.xlu0 %1349 }
 0x45a   : > { %2231 = vrcp.f32 %v1350_v22 }
 0x45b   : > { %v1233_v21 = vpack.c.bf16 %v1232_v20, %v1232_v20  ;;  %2233 = vrcp.f32 %v2515_v10 }
 0x45d   : > { %1985 = vmatmul.msk.bf16.vlgmr.msra.gmra.mxu1 %vm951_vm9, %v1233_v21 }
 0x460   : > { %v2232_v23 = vpop.eup %2231 }
 0x461   : > { %v1352_v24 = vmul.f32 %v2232_v23, %v2888_v42  ;;  %v2234_v11 = vpop.eup %2233 }
 0x462   : > { %v1497_v12 = vmul.f32 32.0, %v2234_v11  ;;  %vm1501_vm13 = vweird.f32 %v2234_v11 }
 0x463   : > { %v1353_v25 = vpack.c.bf16 %v1352_v24, %v1352_v24 }
 0x464   : > { %v1498_v13 = vsub.f32 1.0, %v1497_v12 }
 0x466   : > { %v1499_v14 = vmul.f32 %v2234_v11, %v1498_v13 }
 0x468   : > { %v1500_v15 = vadd.f32 %v2234_v11, %v1499_v14 }
 0x46d   : > { %1989 = vmatmul.msk.bf16.vlgmr.msrb.gmra.mxu1 %vm951_vm9, %v1353_v25  ;;  %v2045_v25 = vld [vmem:[%s2759_s28 + $0x8] sm:$0xff] }
 0x46e   : > { %1581 = vmatpush.bf16.msra.mxu1 %v2045_v25 }
 0x477   : > { %v1001_v26 = vpop.f32.mrf.mxu2 }
 0x47f   : > { %v1003_v27 = vpop.f32.mrf.mxu2 }
 0x487   : > { %v1057_v28 = vpop.f32.mrf.mxu2 }
 0x48f   : > { %v1059_v29 = vpop.f32.mrf.mxu2 }
 0x490   : > { %v2044_v29 = vld [vmem:[%s2759_s28] sm:$0xff] }
 0x491   : > { %1582 = vmatpush.bf16.msra.mxu1 %v2044_v29 }
 0x497   : > { %v1177_v30 = vpop.f32.mrf.mxu2 }
 0x49f   : > { %v1179_v31 = vpop.f32.mrf.mxu2 }
 0x4c6   : > { %v1307_v32 = vpop.f32.mrf.mxu2 }
 0x4c7   : > { %v2186_v33 = vpack.i.bf16 %v1307_v32, %v1057_v28 }
 0x4c9   : > { %v1121_v34 = vpop.f32.mrf.mxu1  ;;  %2187 = vrot.lane.b32.xlu2 %v2186_v33, %s2513_s14 }
 0x4ce   : > { %v1309_v35 = vpop.f32.mrf.mxu2 }
 0x4d1   : > { %v1123_v36 = vpop.f32.mrf.mxu1 }
 0x4d8   : > { %v1427_v37 = vpop.f32.mrf.mxu2 }
 0x4d9   : > { %v2181_v38 = vpack.i.bf16 %v1427_v37, %v1177_v30 }
 0x4da   : > { %v1251_v39 = vpop.f32.mrf.mxu1 }
 0x4db   : > { %2182 = vrot.lane.b32.xlu0 %v2181_v38, %s2513_s14 }
 0x4e0   : > { %v1429_v40 = vpop.f32.mrf.mxu2 }
 0x4e2   : > { %v1253_v41 = vpop.f32.mrf.mxu1 }
 0x4ea   : > { %v1371_v42 = vpop.f32.mrf.mxu1 }
 0x4f2   : > { %v1373_v43 = vpop.f32.mrf.mxu1 }
 0x523   : > { %v2188_v44 = vpop.permute.xlu2 %2187 }
 0x524   : > { %v2190_v45 = vunpack.i.h.bf16 %v2188_v44  ;;  %v2189_v46 = vunpack.i.l.bf16 %v2188_v44 }
 0x526   : > { %v1065_v47 = vsel %vm951_vm9, %v1001_v26, %v2189_v46  ;;  %v1315_v48 = vsel %vm951_vm9, %v1251_v39, %v2190_v45  ;;  %v2195_v45 = vld [vmem:[%s3070_s27] ss:$0 sm:$0xff] }
 0x527   : > { %v1066_v62 = vpack.c.bf16 %v1065_v47, %v1065_v47  ;;  %v1316_v49 = vpack.c.bf16 %v1315_v48, %v1315_v48 }
 0x529   : > { %1068 = vst.msk [vmem:[#allocation2] sm:$0xf] %vm1067_vm11, %v1066_v62  ;;  %v2196_v62 = vld [vmem:[%s3071_s3] ss:$0 sm:$0xff] }
 0x52a   : > { %1318 = vst.msk [vmem:[#allocation2 + $0x4] sm:$0xf] %vm1067_vm11, %v1316_v49 }
 0x54d   : > { %v2183_v50 = vpop.permute.xlu0 %2182 }
 0x54e   : > { %v2185_v51 = vunpack.i.h.bf16 %v2183_v50  ;;  %v2184_v52 = vunpack.i.l.bf16 %v2183_v50 }
 0x550   : > { %v1435_v53 = vsel %vm951_vm9, %v1371_v42, %v2185_v51  ;;  %v1185_v56 = vsel %vm951_vm9, %v1121_v34, %v2184_v52 }
 0x551   : > { %v1436_v57 = vpack.c.bf16 %v1435_v53, %v1435_v53  ;;  %v1186_v3 = vpack.c.bf16 %v1185_v56, %v1185_v56 }
 0x553   : > { %1438 = vrot.lane.b32.xlu1 %v1436_v57, %s2514_s2  ;;  %1188 = vrot.lane.b32.xlu2 %v1186_v3, %s2514_s2  ;;  %v2049_v57 = vld [vmem:[%s2769_s25 + $0x18] sm:$0xff]  ;;  %v2048_v3 = vld [vmem:[%s2769_s25 + $0x10] sm:$0xff]  ;;  %s2517_s2 = smov 128  }
 0x554   : > { %1652 = vmatpush.bf16.msra.mxu3 %v2049_v57 }
 0x558   : > { %1653 = vmatpush.bf16.msra.mxu3 %v2048_v3 }
 0x55c   : > { %1654 = vmatpush.bf16.msra.mxu3 %v2047_v58 }
 0x5ad   : > { %v1189_v60 = vpop.permute.xlu2 %1188 }
 0x5ae   : > { %1192 = vst.msk [vmem:[#allocation2] sm:$0xf] %vm1191_vm12, %v1189_v60 }
 0x5c5   : > { %v1439_v61 = vpop.permute.xlu1 %1438 }
 0x5c6   : > { %1441 = vst.msk [vmem:[#allocation2 + $0x4] sm:$0xf] %vm1191_vm12, %v1439_v61  ;;  %v2046_v61 = vld [vmem:[%s2769_s25] sm:$0xff] }
 0x5c7   : > { %1655 = vmatpush.bf16.msra.mxu3 %v2046_v61 }
 0x5cd   : > { %v2041_v63 = vld [vmem:[#allocation2] sm:$0xff] }
 0x5ce   : > { %2004 = vmatmul.msk.bf16.vlgmr.msra.gmra.mxu0 %vm922_vm8, %v2041_v63 }
 0x64b   : > { %v1481_v1 = vpop.f32.mrf.mxu0 }
 0x64c   : > { %v1482_v2 = vadd.f32 %v2194_v0, %v1481_v1 }
 0x64e   : > { %v1486_v4 = vadd.f32 %v1482_v2, %v2791_v54  ;;  %v2935_v54 = vsel %vm1501_vm13, %v2234_v11, %v1500_v15 }
 0x650   : > { %v1490_v5 = vsel %vm922_vm8, %v1486_v4, 0.0 }
 0x651   : > { %1491 = vadd.xlane.f32.xlu0 %v1490_v5 }
 0x653   : > { %v1483_v6 = vpop.f32.mrf.mxu0 }
 0x654   : > { %v1484_v7 = vadd.f32 %v2194_v0, %v1483_v6 }
 0x656   : > { %v1487_v8 = vadd.f32 %v1484_v7, %v2793_v55 }
 0x658   : > { %v1493_v9 = vsel %vm922_vm8, %v1487_v8, 0.0 }
 0x659   : > { %1494 = vadd.xlane.f32.xlu2 %v1493_v9 }
 0x6c4   : > { %v1492_v16 = vpop.xlane.xlu0 %1491 }
 0x6c5   : > { %v1503_v17 = vmul.f32 %v2935_v54, %v1492_v16 }
 0x6c7   : > { %v1505_v18 = vsub.f32 %v1486_v4, %v1503_v17 }
 0x6c9   : > { %v1507_v55 = vmul.f32 %v1505_v18, %v1505_v18 }
 0x6cb   : > { %v1509_v19 = vsel %vm922_vm8, %v1507_v55, 0.0 }
 0x6cc   : > { %v1495_v20 = vpop.xlane.xlu2 %1494  ;;  %1510 = vadd.xlane.f32.xlu1 %v1509_v19 }
 0x6cd   : > { %v1504_v21 = vmul.f32 %v2935_v54, %v1495_v20 }
 0x6cf   : > { %v1506_v22 = vsub.f32 %v1487_v8, %v1504_v21  ;;  %v2198_v21 = vld [vmem:[%s818_s16] ss:$0 sm:$0xff] }
 0x6d1   : > { %v1508_v23 = vmul.f32 %v1506_v22, %v1506_v22 }
 0x6d3   : > { %v1512_v24 = vsel %vm922_vm8, %v1508_v23, 0.0 }
 0x6d4   : > { %1513 = vadd.xlane.f32.xlu2 %v1512_v24 }
 0x73f   : > { %v1511_v26 = vpop.xlane.xlu1 %1510 }
 0x740   : > { %v1515_v27 = vmul.f32 %v1511_v26, %v2935_v54 }
 0x742   : > { %v1517_v28 = vadd.f32 1e-12, %v1515_v27 }
 0x744   : > { %2235 = vrsqrt.f32 %v1517_v28  ;;  %vm1525_vm15 = vweird.f32 %v1517_v28 }
 0x747   : > { %v1514_v30 = vpop.xlane.xlu2 %1513 }
 0x748   : > { %v1516_v31 = vmul.f32 %v1514_v30, %v2935_v54 }
 0x74a   : > { %v2236_v32 = vpop.eup %2235  ;;  %v1518_v33 = vadd.f32 1e-12, %v1516_v31 }
 0x74b   : > { %v1520_v34 = vmul.f32 %v2236_v32, %v1517_v28  ;;  %vm1526_vm14 = vweird.f32 %v2236_v32 }
 0x74c   : > { %2237 = vrsqrt.f32 %v1518_v33  ;;  %vm1527_vm0 = vmor %vm1525_vm15, %vm1526_vm14  ;;  %vm1535_vm2 = vweird.f32 %v1518_v33 }
 0x74d   : > { %v1521_v35 = vmul.f32 %v2236_v32, %v1520_v34 }
 0x74f   : > { %v1522_v36 = vmul.f32 0.5, %v1521_v35 }
 0x751   : > { %v1523_v37 = vsub.f32 1.5, %v1522_v36 }
 0x752   : > { %v2238_v38 = vpop.eup %2237 }
 0x753   : > { %v1524_v39 = vmul.f32 %v2236_v32, %v1523_v37  ;;  %v1530_v40 = vmul.f32 %v2238_v38, %v1518_v33  ;;  %vm1536_vm1 = vweird.f32 %v2238_v38 }
 0x754   : > { %vm1537_vm3 = vmor %vm1535_vm2, %vm1536_vm1 }
 0x755   : > { %v1531_v41 = vmul.f32 %v2238_v38, %v1530_v40  ;;  %v1528_v42 = vsel %vm1527_vm0, %v2236_v32, %v1524_v39 }
 0x756   : > { %v1539_v46 = vmul.f32 %v1528_v42, %v1505_v18 }
 0x757   : > { %v1532_v43 = vmul.f32 0.5, %v1531_v41 }
 0x758   : > { %v1544_v49 = vmul.f32 %v2195_v45, %v1539_v46 }
 0x759   : > { %v1533_v44 = vsub.f32 1.5, %v1532_v43 }
 0x75a   : > { %v1549_v52 = vadd.f32 %v2196_v62, %v1544_v49 }
 0x75b   : > { %v1534_v47 = vmul.f32 %v2238_v38, %v1533_v44 }
 0x75d   : > { %v1538_v48 = vsel %vm1537_vm3, %v2238_v38, %v1534_v47 }
 0x75e   : > { %v1540_v50 = vmul.f32 %v1538_v48, %v1506_v22 }
 0x760   : > { %v1545_v51 = vmul.f32 %v2195_v45, %v1540_v50 }
 0x762   : > { %v1550_v53 = vadd.f32 %v2196_v62, %v1545_v51 }
 0x764   : > { %v1551_v56 = vpack.c.bf16 %v1550_v53, %v1549_v52 }
 0x766   : > { %2013 = vmatmul.msk.bf16.vlgmr.msra.gmra.mxu1 %vm922_vm8, %v1551_v56 }
 0x7e3   : > { %v1584_v60 = vpop.f32.mrf.mxu1 }
 0x7e4   : > { %v1585_v63 = vadd.f32 %v2197_v59, %v1584_v60 }
 0x7e6   : > { %v1589_v0 = vmul.f32 %v1585_v63, %v1585_v63 }
 0x7e8   : > { %v1591_v1 = vmul.f32 %v1589_v0, %v1585_v63 }
 0x7ea   : > { %v1593_v2 = vmul.f32 0.044715, %v1591_v1 }
 0x7eb   : > { %v1586_v4 = vpop.f32.mrf.mxu1 }
 0x7ec   : > { %v1595_v5 = vadd.f32 %v1593_v2, %v1585_v63  ;;  %v1587_v6 = vadd.f32 %v2197_v59, %v1586_v4 }
 0x7ee   : > { %v1597_v7 = vmul.f32 0.7978846, %v1595_v5  ;;  %v1590_v8 = vmul.f32 %v1587_v6, %v1587_v6 }
 0x7f0   : > { %v1592_v9 = vmul.f32 %v1590_v8, %v1587_v6  ;;  %2239 = vtanh.f32 %v1597_v7 }
 0x7f2   : > { %v1594_v10 = vmul.f32 0.044715, %v1592_v9 }
 0x7f4   : > { %v1596_v11 = vadd.f32 %v1594_v10, %v1587_v6 }
 0x7f6   : > { %v1598_v12 = vmul.f32 0.7978846, %v1596_v11  ;;  %v2240_v13 = vpop.eup %2239 }
 0x7f7   : > { %v1601_v14 = vadd.f32 1.0, %v2240_v13 }
 0x7f8   : > { %2241 = vtanh.f32 %v1598_v12 }
 0x7f9   : > { %v1603_v16 = vmul.f32 0.5, %v1601_v14 }
 0x7fb   : > { %v1605_v55 = vmul.f32 %v1603_v16, %v1585_v63 }
 0x7fe   : > { %v2242_v15 = vpop.eup %2241 }
 0x7ff   : > { %v1602_v17 = vadd.f32 1.0, %v2242_v15 }
 0x801   : > { %v1604_v18 = vmul.f32 0.5, %v1602_v17 }
 0x803   : > { %v1606_v19 = vmul.f32 %v1604_v18, %v1587_v6 }
 0x805   : > { %v1607_v20 = vpack.c.bf16 %v1606_v19, %v1605_v55 }
 0x807   : > { %2030 = vmatmul.msk.bf16.vlgmr.msra.gmra.mxu3 %vm1644_vm4, %v1607_v20 }
 0x88a   : > { %v1657_v22 = vpop.f32.mrf.mxu3 }
 0x88b   : > { %v1658_v23 = vadd.f32 %v2198_v21, %v1657_v22 }
 0x88d   : > { %v1662_v24 = vadd.f32 %v1658_v23, %v1549_v52 }
 0x88f   : > { %v1666_v25 = vsel %vm922_vm8, %v1662_v24, 0.0 }
 0x890   : > { %1667 = vadd.xlane.f32.xlu0 %v1666_v25 }
 0x892   : > { %v1659_v26 = vpop.f32.mrf.mxu3 }
 0x893   : > { %v1660_v27 = vadd.f32 %v2198_v21, %v1659_v26 }
 0x895   : > { %v1663_v28 = vadd.f32 %v1660_v27, %v1550_v53  ;;  %v2199_v53 = vld [vmem:[%s2719_s21] ss:$0 sm:$0xff]  ;;  %s2516_s21 = smov [#allocation12]  }
 0x896   : > { %s1730_s11 = sshll.u32 %s2516_s21, 4  ;;  %s1731_s11 = int_to_ptr.vmem [resolvable:$true] %s1730_s11 }
 0x897   : > { %v1669_v29 = vsel %vm922_vm8, %v1663_v28, 0.0 }
 0x898   : > { %1670 = vadd.xlane.f32.xlu2 %v1669_v29 }
 0x903   : > { %v1668_v30 = vpop.xlane.xlu0 %1667 }
 0x904   : > { %v1672_v31 = vmul.f32 %v1668_v30, %v2935_v54 }
 0x906   : > { %v1674_v32 = vsub.f32 %v1662_v24, %v1672_v31 }
 0x908   : > { %v1676_v33 = vmul.f32 %v1674_v32, %v1674_v32 }
 0x90a   : > { %v1678_v34 = vsel %vm922_vm8, %v1676_v33, 0.0 }
 0x90b   : > { %v1671_v35 = vpop.xlane.xlu2 %1670  ;;  %1679 = vadd.xlane.f32.xlu0 %v1678_v34 }
 0x90c   : > { %v1673_v36 = vmul.f32 %v1671_v35, %v2935_v54 }
 0x90e   : > { %v1675_v37 = vsub.f32 %v1663_v28, %v1673_v36 }
 0x910   : > { %v1677_v38 = vmul.f32 %v1675_v37, %v1675_v37 }
 0x912   : > { %v1681_v39 = vsel %vm922_vm8, %v1677_v38, 0.0 }
 0x913   : > { %1682 = vadd.xlane.f32.xlu2 %v1681_v39 }
 0x97e   : > { %v1680_v40 = vpop.xlane.xlu0 %1679 }
 0x97f   : > { %v1684_v41 = vmul.f32 %v1680_v40, %v2935_v54 }
 0x981   : > { %v1686_v42 = vadd.f32 1e-12, %v1684_v41 }
 0x983   : > { %2243 = vrsqrt.f32 %v1686_v42  ;;  %vm1694_vm6 = vweird.f32 %v1686_v42 }
 0x986   : > { %v1683_v43 = vpop.xlane.xlu2 %1682 }
 0x987   : > { %v1685_v44 = vmul.f32 %v1683_v43, %v2935_v54  ;;  %v2200_v54 = vld [vmem:[%s821_s24] ss:$0 sm:$0xff]  ;;  %s1732_s24 = sshll.u32 %s3075_s23, 4  ;;  %s1733_s24 = int_to_ptr.hbm [resolvable:$true] %s1732_s24 }
 0x989   : > { %v2244_v45 = vpop.eup %2243  ;;  %v1687_v46 = vadd.f32 1e-12, %v1685_v44 }
 0x98a   : > { %v1689_v47 = vmul.f32 %v2244_v45, %v1686_v42  ;;  %vm1695_vm5 = vweird.f32 %v2244_v45 }
 0x98b   : > { %2245 = vrsqrt.f32 %v1687_v46  ;;  %vm1696_vm7 = vmor %vm1694_vm6, %vm1695_vm5  ;;  %vm1704_vm10 = vweird.f32 %v1687_v46 }
 0x98c   : > { %v1690_v48 = vmul.f32 %v2244_v45, %v1689_v47 }
 0x98e   : > { %v1691_v62 = vmul.f32 0.5, %v1690_v48 }
 0x990   : > { %v1692_v49 = vsub.f32 1.5, %v1691_v62 }
 0x991   : > { %v2246_v50 = vpop.eup %2245 }
 0x992   : > { %v1693_v51 = vmul.f32 %v2244_v45, %v1692_v49  ;;  %v1699_v52 = vmul.f32 %v2246_v50, %v1687_v46  ;;  %vm1705_vm9 = vweird.f32 %v2246_v50 }
 0x993   : > { %vm1706_vm11 = vmor %vm1704_vm10, %vm1705_vm9 }
 0x994   : > { %v1697_v56 = vsel %vm1696_vm7, %v2244_v45, %v1693_v51  ;;  %v1700_v57 = vmul.f32 %v2246_v50, %v1699_v52 }
 0x995   : > { %v1708_v3 = vmul.f32 %v1697_v56, %v1674_v32 }
 0x996   : > { %v1701_v58 = vmul.f32 0.5, %v1700_v57 }
 0x997   : > { %v1713_v59 = vmul.f32 %v2199_v53, %v1708_v3 }
 0x998   : > { %v1702_v60 = vsub.f32 1.5, %v1701_v58 }
 0x999   : > { %v1718_v61 = vadd.f32 %v2200_v54, %v1713_v59 }
 0x99a   : > { %v1703_v63 = vmul.f32 %v2246_v50, %v1702_v60 }
 0x99b   : > { %1720 = vst.msk [vmem:[#allocation12] sm:$0xff] %vm922_vm8, %v1718_v61 }
 0x99c   : > { %v1707_v0 = vsel %vm1706_vm11, %v2246_v50, %v1703_v63 }
 0x99d   : > { %v1709_v1 = vmul.f32 %v1707_v0, %v1675_v37 }
 0x99f   : > { %v1714_v2 = vmul.f32 %v2199_v53, %v1709_v1 }
 0x9a1   : > { %v1719_v4 = vadd.f32 %v2200_v54, %v1714_v2 }
 0x9a3   : > { %1721 = vst.msk [vmem:[#allocation12 + $0x8] sm:$0xff] %vm922_vm8, %v1719_v4 }
 0x9a4   : > { %2069 = dma.vmem_to_hbm [thread:$0]  (%p2098_p3), %s1731_s11, 256, %s1733_s24, [#allocation5], %s2517_s2, %s2517_s2, %s2513_s14  }
 0x9a5   : > { %2466 = dma.done.wait (%p2098_p3), [#allocation5], 256  }
 0x9a6   : > { %2468 = vsyncadd (%p2098_p3), [#allocation5], 4294967040 }
 0x9a7 PF: > { %s3076_s5 = sld [smem:[#allocation21_spill]] }
 0x9a8   : > { %s3077_s24 = sld [smem:[#allocation18_spill]] }
 0x9a9   : > { %s3078_s25 = sld [smem:[#allocation19_spill]] }
 0x9aa   : > { %s3079_s26 = sld [smem:[#allocation23_spill]] }
 0x9ab   : > { %s3080_s27 = sld [smem:[#allocation20_spill]] }
 0x9ac   : > { %s3081_s28 = sld [smem:[#allocation22_spill]] }
 0x9ad   : > { %s31_s29 = sadd.s32 1, %s3076_s5  }
 0x9ae   : > { %p28_p4 = scmp.ge.s32.totalorder %s31_s29, 4  }
 0x9b0   :  { %30 = sbr.rel (!%p28_p4) target bundleno = 21 (0x15), region = 182 }
 0x9b5   :  { %1749 = vsyncpa [#allocation4], 1 }
 0x9b6   :  { %1751 = vsyncpa [#allocation4 + $0x1], 1 }
 0x9b7   :  { %1752 = vsyncpa [#allocation7], 1 }
 0x9b8   :  { %1753 = vsyncpa [#allocation10], 1 }
 0x9b9   :  { %1754 = vsyncpa [#allocation5], 1 }
 0x9ba   :  { %1756 = vsyncpa [#allocation5 + $0x1], 1 }

</bundles_post_ra>
